<compile_context>
chip_gen: v7x
topology: tpu7x:2x2x1
jax: 0.10.0
libtpu: 0.0.40
codegen_flags: <defaults>
</compile_context>

<pallas_src>
import numpy as np

import jax
import jax.numpy as jnp
from jax.experimental import pallas as pl
from jax.experimental.pallas import tpu as pltpu

NEG_SLOPE = 0.01          # nn.LeakyReLU(0.01) in the reference module


# ---------------------------------------------------------------------------
# In-kernel helpers
# ---------------------------------------------------------------------------
def _leaky(v):
    return jnp.where(v >= 0.0, v, NEG_SLOPE * v)


def _conv_block(g_ref, w_ref, h_in, bias=None, act=False):
    """Conv-style layer on a VMEM-resident activation matrix.

    h_in : (P, Cin) bf16, rows = spatial positions (row-major), cols = channels
    g_ref: (kk*Mp, P) bf16 constant 0/1 gather matrix (in-VMEM im2col)
    w_ref: (kk, Cin, Cout) bf16 per-offset weight stack
    Returns (Mp, Cout) f32 (rows >= real M are padding rows, never read later).
    """
    kk, _, cout = w_ref.shape
    mp = g_ref.shape[0] // kk
    # One MXU matmul extracts every (di, dj) patch slab at once.
    cols = jnp.dot(g_ref[...], h_in,
                   preferred_element_type=jnp.float32).astype(jnp.bfloat16)
    acc = jnp.zeros((mp, cout), jnp.float32)
    for k in range(kk):                       # static unroll, 8-aligned slices
        acc = acc + jnp.dot(cols[k * mp:(k + 1) * mp, :], w_ref[k],
                            preferred_element_type=jnp.float32)
    if bias is not None:
        acc = acc + bias
    if act:
        acc = _leaky(acc)
    return acc


def _discriminator_kernel(cols1_ref, w1_ref, b1_ref,
                          g2_ref, w2_ref, b2_ref,
                          g3_ref, w3_ref, b3_ref,
                          gh_ref, wh_ref, bh_ref,
                          out_ref):
    # ---- conv0: im2col GEMM (patches prepared by the wrapper) --------------
    h1 = jnp.dot(cols1_ref[0], w1_ref[...],
                 preferred_element_type=jnp.float32)            # (64, 8)
    h1 = _leaky(h1 + b1_ref[...]).astype(jnp.bfloat16)

    # ---- conv1 / conv2 of the trunk: in-VMEM im2col + accumulation ---------
    h2 = _conv_block(g2_ref, w2_ref, h1, b2_ref[...], True)     # (16, 16)
    h2 = h2.astype(jnp.bfloat16)
    h3 = _conv_block(g3_ref, w3_ref, h2, b3_ref[...], True)     # (8, 32); rows 4..7 never read
    h3 = h3.astype(jnp.bfloat16)

    # ---- fused heads: 3x3 conv (rows 0..3, lane 0) + fc (row 4, lanes 0..6)
    out_ref[0] = _conv_block(gh_ref, wh_ref, h3, bh_ref[...], False)   # (8, 128)


# ---------------------------------------------------------------------------
# One-time constant construction (gather matrices, packed weights)
# ---------------------------------------------------------------------------
def _build_conv_gather(hw_in, ksize, stride, pad, m_pad, p_cols):
    """0/1 matrix of shape (k*k*m_pad, p_cols); block k selects, for every
    output pixel m (row-major), the input pixel of patch offset k (zero row
    if the offset falls in the padding or m is a pad row)."""
    ho = (hw_in + 2 * pad - ksize) // stride + 1
    g = np.zeros((ksize * ksize * m_pad, p_cols), np.float32)
    for di in range(ksize):
        for dj in range(ksize):
            k = di * ksize + dj
            for oy in range(ho):
                for ox in range(ho):
                    m = oy * ho + ox
                    iy = stride * oy + di - pad
                    ix = stride * ox + dj - pad
                    if 0 <= iy < hw_in and 0 <= ix < hw_in:
                        g[k * m_pad + m, iy * hw_in + ix] = 1.0
    return g


def init_discriminator_params(key, first_dim=8, repeat_num=3, in_ch=6, num_cls=7):
    """PyTorch-layout parameters (OIHW conv weights, torch Linear layout)."""
    params = {"convs": []}
    cdim = first_dim
    key, kw, kb = jax.random.split(key, 3)
    params["convs"].append({
        "w": 0.05 * jax.random.normal(kw, (cdim, in_ch, 4, 4), jnp.float32),
        "b": 0.01 * jax.random.normal(kb, (cdim,), jnp.float32)})
    for _ in range(1, repeat_num):
        key, kw, kb = jax.random.split(key, 3)
        params["convs"].append({
            "w": 0.05 * jax.random.normal(kw, (cdim * 2, cdim, 4, 4), jnp.float32),
            "b": 0.01 * jax.random.normal(kb, (cdim * 2,), jnp.float32)})
        cdim *= 2
    key, kw = jax.random.split(key)
    params["conv1_w"] = 0.05 * jax.random.normal(kw, (1, cdim, 3, 3), jnp.float32)
    key, kw, kb = jax.random.split(key, 3)
    params["fc_w"] = 0.05 * jax.random.normal(kw, (num_cls, cdim * 2 * 2), jnp.float32)
    params["fc_b"] = 0.01 * jax.random.normal(kb, (num_cls,), jnp.float32)
    return params


def prepare_discriminator(params):
    """Pack weights (bf16) and build the constant gather matrices once."""
    c0, c1, c2 = params["convs"]
    assert c0["w"].shape == (8, 6, 4, 4)
    assert c1["w"].shape == (16, 8, 4, 4)
    assert c2["w"].shape == (32, 16, 4, 4)
    assert params["conv1_w"].shape == (1, 32, 3, 3)
    assert params["fc_w"].shape == (7, 128)

    def wstack(w):                      # OIHW -> (kH*kW, Cin, Cout) bf16
        co, ci, kh, kw = w.shape
        return jnp.transpose(w, (2, 3, 1, 0)).reshape(kh * kw, ci, co).astype(jnp.bfloat16)

    def brow(b):
        return jnp.asarray(b, jnp.float32).reshape(1, -1)

    # ---- fused head: 3x3 conv (no bias) + fc over torch-NCHW-flattened h ---
    # The NCHW flatten permutation (idx = c*4 + s) is folded into the weights.
    conv1_w = np.asarray(params["conv1_w"], np.float32)        # (1, 32, 3, 3)
    fc_w = np.asarray(params["fc_w"], np.float32)              # (7, 128)
    fc_b = np.asarray(params["fc_b"], np.float32)              # (7,)

    wh = np.zeros((13, 32, 128), np.float32)
    wh[:9, :, 0:1] = np.transpose(conv1_w, (2, 3, 1, 0)).reshape(9, 32, 1)
    wh[9:, :, :7] = np.transpose(fc_w.reshape(7, 32, 4), (2, 1, 0))  # vfc[s,c,j]

    gh = np.zeros((13 * 8, 8), np.float32)
    gh[:9 * 8, :] = _build_conv_gather(2, 3, 1, 1, m_pad=8, p_cols=8)
    for s in range(4):                  # extra "offsets": drop h[s,:] into row 4
        gh[(9 + s) * 8 + 4, s] = 1.0

    bh = np.zeros((8, 128), np.float32)
    bh[4, :7] = fc_b                    # fc bias lands on the cls row only

    return {
        "w1": jnp.transpose(c0["w"], (2, 3, 1, 0)).reshape(4 * 4 * 6, 8).astype(jnp.bfloat16),
        "b1": brow(c0["b"]),
        "g2": jnp.asarray(_build_conv_gather(8, 4, 2, 1, m_pad=16, p_cols=64), jnp.bfloat16),
        "w2": wstack(c1["w"]),
        "b2": brow(c1["b"]),
        "g3": jnp.asarray(_build_conv_gather(4, 4, 2, 1, m_pad=8, p_cols=16), jnp.bfloat16),
        "w3": wstack(c2["w"]),
        "b3": brow(c2["b"]),
        "gh": jnp.asarray(gh, jnp.bfloat16),
        "wh": jnp.asarray(wh, jnp.bfloat16),
        "bh": jnp.asarray(bh, jnp.float32),
    }


# ---------------------------------------------------------------------------
# Forward pass
# ---------------------------------------------------------------------------
def _im2col_first_layer(x_nchw):
    """Tiny XLA-side patch extraction for conv0 only: (N,6,16,16) -> (N,64,96)
    with columns ordered (di, dj, cin) to match the packed w1."""
    n, c, hh, ww = x_nchw.shape
    ho, wo = hh // 2, ww // 2
    x = jnp.transpose(x_nchw, (0, 2, 3, 1)).astype(jnp.float32)      # NHWC
    xp = jnp.pad(x, ((0, 0), (1, 1), (1, 1), (0, 0)))
    patches = []
    for di in range(4):
        for dj in range(4):
            patches.append(xp[:, di:di + 2 * ho:2, dj:dj + 2 * wo:2, :])
    cols = jnp.stack(patches, axis=3)                                # (N,Ho,Wo,16,C)
    return cols.reshape(n, ho * wo, 16 * c).astype(jnp.bfloat16)


@jax.jit
def discriminator_forward(packed, x_nchw):
    n = x_nchw.shape[0]
    cols1 = _im2col_first_layer(x_nchw)                              # (N, 64, 96) bf16

    keys = ("w1", "b1", "g2", "w2", "b2", "g3", "w3", "b3", "gh", "wh", "bh")

    def shared_spec(shape):
        nd = len(shape)
        return pl.BlockSpec(tuple(shape), lambda i, _nd=nd: (0,) * _nd)

    in_specs = [pl.BlockSpec((1,) + tuple(cols1.shape[1:]), lambda i: (i, 0, 0))]
    in_specs += [shared_spec(packed[k].shape) for k in keys]

    out = pl.pallas_call(
        _discriminator_kernel,
        out_shape=jax.ShapeDtypeStruct((n, 8, 128), jnp.float32),
        grid=(n,),
        in_specs=in_specs,
        out_specs=pl.BlockSpec((1, 8, 128), lambda i: (i, 0, 0)),
        compiler_params=pltpu.CompilerParams(
            dimension_semantics=("parallel",)),                      # 2 TCs on v7x
    )(cols1, *[packed[k] for k in keys])

    # rows 0..3 / lane 0 hold the 2x2 conv1 map (row-major); row 4 / lanes 0..6
    # hold the 7 class logits.
    out_real = jnp.squeeze(out[:, :4, 0].reshape(n, 1, 2, 2))        # torch .squeeze()
    out_cls = out[:, 4, :7]                                          # (N, 7)
    return out_real, out_cls


# ---------------------------------------------------------------------------
if __name__ == "__main__":
    IMAGE_SIZE, FIRST_DIM, REPEAT_NUM = 16, 8, 3     # small config: 16 -> 8 -> 4 -> 2
    key = jax.random.PRNGKey(0)
    key, xkey = jax.random.split(key)

    params = init_discriminator_params(key, first_dim=FIRST_DIM,
                                       repeat_num=REPEAT_NUM)
    packed = prepare_discriminator(params)
    x = jax.random.normal(xkey, (2, 6, IMAGE_SIZE, IMAGE_SIZE), jnp.float32)

    out_real, out_cls = discriminator_forward(packed, x)
    jax.block_until_ready(out_real)
    jax.block_until_ready(out_cls)

    assert out_real.shape == (2, 2, 2), out_real.shape
    assert out_cls.shape == (2, 7), out_cls.shape
    print("KERNEL_OK")
</pallas_src>

<mosaic_0001>
module attributes {stable_mosaic.version = 11 : i64} {
  func.func @_discriminator_kernel(%arg0: i32, %arg1: memref<1x64x96xbf16, #tpu.memory_space<vmem>>, %arg2: memref<96x8xbf16, #tpu.memory_space<vmem>>, %arg3: memref<1x8xf32, #tpu.memory_space<vmem>>, %arg4: memref<256x64xbf16, #tpu.memory_space<vmem>>, %arg5: memref<16x8x16xbf16, #tpu.memory_space<vmem>>, %arg6: memref<1x16xf32, #tpu.memory_space<vmem>>, %arg7: memref<128x16xbf16, #tpu.memory_space<vmem>>, %arg8: memref<16x16x32xbf16, #tpu.memory_space<vmem>>, %arg9: memref<1x32xf32, #tpu.memory_space<vmem>>, %arg10: memref<104x8xbf16, #tpu.memory_space<vmem>>, %arg11: memref<13x32x128xbf16, #tpu.memory_space<vmem>>, %arg12: memref<8x128xf32, #tpu.memory_space<vmem>>, %arg13: memref<1x8x128xf32, #tpu.memory_space<vmem>>) attributes {dimension_semantics = [#tpu.dimension_semantics<parallel>], iteration_bounds = array<i64: 2>, scalar_prefetch = 0 : i64, scratch_operands = 0 : i64, tpu.core_type = #tpu.core_type<tc>, window_params = [{transform_indices = @transform_0, window_bounds = array<i64: 1, 64, 96>}, {pipeline_mode = #tpu.pipeline_mode<synchronous>, transform_indices = @transform_1, window_bounds = array<i64: 96, 8>}, {pipeline_mode = #tpu.pipeline_mode<synchronous>, transform_indices = @transform_2, window_bounds = array<i64: 1, 8>}, {pipeline_mode = #tpu.pipeline_mode<synchronous>, transform_indices = @transform_3, window_bounds = array<i64: 256, 64>}, {pipeline_mode = #tpu.pipeline_mode<synchronous>, transform_indices = @transform_4, window_bounds = array<i64: 16, 8, 16>}, {pipeline_mode = #tpu.pipeline_mode<synchronous>, transform_indices = @transform_5, window_bounds = array<i64: 1, 16>}, {pipeline_mode = #tpu.pipeline_mode<synchronous>, transform_indices = @transform_6, window_bounds = array<i64: 128, 16>}, {pipeline_mode = #tpu.pipeline_mode<synchronous>, transform_indices = @transform_7, window_bounds = array<i64: 16, 16, 32>}, {pipeline_mode = #tpu.pipeline_mode<synchronous>, transform_indices = @transform_8, window_bounds = array<i64: 1, 32>}, {pipeline_mode = #tpu.pipeline_mode<synchronous>, transform_indices = @transform_9, window_bounds = array<i64: 104, 8>}, {pipeline_mode = #tpu.pipeline_mode<synchronous>, transform_indices = @transform_10, window_bounds = array<i64: 13, 32, 128>}, {pipeline_mode = #tpu.pipeline_mode<synchronous>, transform_indices = @transform_11, window_bounds = array<i64: 8, 128>}, {transform_indices = @transform_12, window_bounds = array<i64: 1, 8, 128>}]} {
    %c0 = arith.constant 0 : index
    %c0_0 = arith.constant 0 : index
    %c0_1 = arith.constant 0 : index
    %0 = vector.load %arg1[%c0, %c0_0, %c0_1] : memref<1x64x96xbf16, #tpu.memory_space<vmem>>, vector<1x64x96xbf16>
    %1 = vector.shape_cast %0 : vector<1x64x96xbf16> to vector<64x96xbf16>
    %c0_2 = arith.constant 0 : index
    %c0_3 = arith.constant 0 : index
    %2 = vector.load %arg2[%c0_2, %c0_3] : memref<96x8xbf16, #tpu.memory_space<vmem>>, vector<96x8xbf16>
    %cst = arith.constant dense<0.000000e+00> : vector<64x8xf32>
    %3 = tpu.matmul %1, %2, %cst {dimension_numbers = #tpu.dot_dimension_numbers<[1], [0], [0], [1], [0, 0, 1, 1], [], []>} : vector<64x96xbf16>, vector<96x8xbf16>, vector<64x8xf32> -> vector<64x8xf32>
    %c0_4 = arith.constant 0 : index
    %c0_5 = arith.constant 0 : index
    %4 = vector.load %arg3[%c0_4, %c0_5] : memref<1x8xf32, #tpu.memory_space<vmem>>, vector<1x8xf32>
    %5 = vector.broadcast %4 : vector<1x8xf32> to vector<64x8xf32>
    %6 = arith.addf %3, %5 : vector<64x8xf32>
    %cst_6 = arith.constant 0.000000e+00 : f32
    %7 = vector.broadcast %cst_6 : f32 to vector<64x8xf32>
    %8 = arith.cmpf oge, %6, %7 : vector<64x8xf32>
    %cst_7 = arith.constant 0.00999999977 : f32
    %9 = vector.broadcast %cst_7 : f32 to vector<64x8xf32>
    %10 = arith.mulf %9, %6 : vector<64x8xf32>
    %11 = arith.select %8, %6, %10 : vector<64x8xi1>, vector<64x8xf32>
    %12 = arith.truncf %11 : vector<64x8xf32> to vector<64x8xbf16>
    %c0_8 = arith.constant 0 : index
    %c0_9 = arith.constant 0 : index
    %13 = vector.load %arg6[%c0_8, %c0_9] : memref<1x16xf32, #tpu.memory_space<vmem>>, vector<1x16xf32>
    %c0_10 = arith.constant 0 : index
    %c0_11 = arith.constant 0 : index
    %14 = vector.load %arg4[%c0_10, %c0_11] : memref<256x64xbf16, #tpu.memory_space<vmem>>, vector<256x64xbf16>
    %cst_12 = arith.constant dense<0.000000e+00> : vector<256x8xf32>
    %15 = tpu.matmul %14, %12, %cst_12 {dimension_numbers = #tpu.dot_dimension_numbers<[1], [0], [0], [1], [0, 0, 1, 1], [], []>} : vector<256x64xbf16>, vector<64x8xbf16>, vector<256x8xf32> -> vector<256x8xf32>
    %16 = arith.truncf %15 : vector<256x8xf32> to vector<256x8xbf16>
    %cst_13 = arith.constant 0.000000e+00 : f32
    %17 = vector.broadcast %cst_13 : f32 to vector<16x16xf32>
    %18 = vector.extract_strided_slice %16 {offsets = [0, 0], sizes = [16, 8], strides = [1, 1]} : vector<256x8xbf16> to vector<16x8xbf16>
    %c0_14 = arith.constant 0 : index
    %c0_15 = arith.constant 0 : index
    %c0_16 = arith.constant 0 : index
    %19 = vector.load %arg5[%c0_14, %c0_15, %c0_16] : memref<16x8x16xbf16, #tpu.memory_space<vmem>>, vector<1x8x16xbf16>
    %20 = vector.shape_cast %19 : vector<1x8x16xbf16> to vector<8x16xbf16>
    %cst_17 = arith.constant dense<0.000000e+00> : vector<16x16xf32>
    %21 = tpu.matmul %18, %20, %cst_17 {dimension_numbers = #tpu.dot_dimension_numbers<[1], [0], [0], [1], [0, 0, 1, 1], [], []>} : vector<16x8xbf16>, vector<8x16xbf16>, vector<16x16xf32> -> vector<16x16xf32>
    %22 = arith.addf %17, %21 : vector<16x16xf32>
    %23 = vector.extract_strided_slice %16 {offsets = [16, 0], sizes = [16, 8], strides = [1, 1]} : vector<256x8xbf16> to vector<16x8xbf16>
    %c1 = arith.constant 1 : index
    %c0_18 = arith.constant 0 : index
    %c0_19 = arith.constant 0 : index
    %24 = vector.load %arg5[%c1, %c0_18, %c0_19] : memref<16x8x16xbf16, #tpu.memory_space<vmem>>, vector<1x8x16xbf16>
    %25 = vector.shape_cast %24 : vector<1x8x16xbf16> to vector<8x16xbf16>
    %cst_20 = arith.constant dense<0.000000e+00> : vector<16x16xf32>
    %26 = tpu.matmul %23, %25, %cst_20 {dimension_numbers = #tpu.dot_dimension_numbers<[1], [0], [0], [1], [0, 0, 1, 1], [], []>} : vector<16x8xbf16>, vector<8x16xbf16>, vector<16x16xf32> -> vector<16x16xf32>
    %27 = arith.addf %22, %26 : vector<16x16xf32>
    %28 = vector.extract_strided_slice %16 {offsets = [32, 0], sizes = [16, 8], strides = [1, 1]} : vector<256x8xbf16> to vector<16x8xbf16>
    %c2 = arith.constant 2 : index
    %c0_21 = arith.constant 0 : index
    %c0_22 = arith.constant 0 : index
    %29 = vector.load %arg5[%c2, %c0_21, %c0_22] : memref<16x8x16xbf16, #tpu.memory_space<vmem>>, vector<1x8x16xbf16>
    %30 = vector.shape_cast %29 : vector<1x8x16xbf16> to vector<8x16xbf16>
    %cst_23 = arith.constant dense<0.000000e+00> : vector<16x16xf32>
    %31 = tpu.matmul %28, %30, %cst_23 {dimension_numbers = #tpu.dot_dimension_numbers<[1], [0], [0], [1], [0, 0, 1, 1], [], []>} : vector<16x8xbf16>, vector<8x16xbf16>, vector<16x16xf32> -> vector<16x16xf32>
    %32 = arith.addf %27, %31 : vector<16x16xf32>
    %33 = vector.extract_strided_slice %16 {offsets = [48, 0], sizes = [16, 8], strides = [1, 1]} : vector<256x8xbf16> to vector<16x8xbf16>
    %c3 = arith.constant 3 : index
    %c0_24 = arith.constant 0 : index
    %c0_25 = arith.constant 0 : index
    %34 = vector.load %arg5[%c3, %c0_24, %c0_25] : memref<16x8x16xbf16, #tpu.memory_space<vmem>>, vector<1x8x16xbf16>
    %35 = vector.shape_cast %34 : vector<1x8x16xbf16> to vector<8x16xbf16>
    %cst_26 = arith.constant dense<0.000000e+00> : vector<16x16xf32>
    %36 = tpu.matmul %33, %35, %cst_26 {dimension_numbers = #tpu.dot_dimension_numbers<[1], [0], [0], [1], [0, 0, 1, 1], [], []>} : vector<16x8xbf16>, vector<8x16xbf16>, vector<16x16xf32> -> vector<16x16xf32>
    %37 = arith.addf %32, %36 : vector<16x16xf32>
    %38 = vector.extract_strided_slice %16 {offsets = [64, 0], sizes = [16, 8], strides = [1, 1]} : vector<256x8xbf16> to vector<16x8xbf16>
    %c4 = arith.constant 4 : index
    %c0_27 = arith.constant 0 : index
    %c0_28 = arith.constant 0 : index
    %39 = vector.load %arg5[%c4, %c0_27, %c0_28] : memref<16x8x16xbf16, #tpu.memory_space<vmem>>, vector<1x8x16xbf16>
    %40 = vector.shape_cast %39 : vector<1x8x16xbf16> to vector<8x16xbf16>
    %cst_29 = arith.constant dense<0.000000e+00> : vector<16x16xf32>
    %41 = tpu.matmul %38, %40, %cst_29 {dimension_numbers = #tpu.dot_dimension_numbers<[1], [0], [0], [1], [0, 0, 1, 1], [], []>} : vector<16x8xbf16>, vector<8x16xbf16>, vector<16x16xf32> -> vector<16x16xf32>
    %42 = arith.addf %37, %41 : vector<16x16xf32>
    %43 = vector.extract_strided_slice %16 {offsets = [80, 0], sizes = [16, 8], strides = [1, 1]} : vector<256x8xbf16> to vector<16x8xbf16>
    %c5 = arith.constant 5 : index
    %c0_30 = arith.constant 0 : index
    %c0_31 = arith.constant 0 : index
    %44 = vector.load %arg5[%c5, %c0_30, %c0_31] : memref<16x8x16xbf16, #tpu.memory_space<vmem>>, vector<1x8x16xbf16>
    %45 = vector.shape_cast %44 : vector<1x8x16xbf16> to vector<8x16xbf16>
    %cst_32 = arith.constant dense<0.000000e+00> : vector<16x16xf32>
    %46 = tpu.matmul %43, %45, %cst_32 {dimension_numbers = #tpu.dot_dimension_numbers<[1], [0], [0], [1], [0, 0, 1, 1], [], []>} : vector<16x8xbf16>, vector<8x16xbf16>, vector<16x16xf32> -> vector<16x16xf32>
    %47 = arith.addf %42, %46 : vector<16x16xf32>
    %48 = vector.extract_strided_slice %16 {offsets = [96, 0], sizes = [16, 8], strides = [1, 1]} : vector<256x8xbf16> to vector<16x8xbf16>
    %c6 = arith.constant 6 : index
    %c0_33 = arith.constant 0 : index
    %c0_34 = arith.constant 0 : index
    %49 = vector.load %arg5[%c6, %c0_33, %c0_34] : memref<16x8x16xbf16, #tpu.memory_space<vmem>>, vector<1x8x16xbf16>
    %50 = vector.shape_cast %49 : vector<1x8x16xbf16> to vector<8x16xbf16>
    %cst_35 = arith.constant dense<0.000000e+00> : vector<16x16xf32>
    %51 = tpu.matmul %48, %50, %cst_35 {dimension_numbers = #tpu.dot_dimension_numbers<[1], [0], [0], [1], [0, 0, 1, 1], [], []>} : vector<16x8xbf16>, vector<8x16xbf16>, vector<16x16xf32> -> vector<16x16xf32>
    %52 = arith.addf %47, %51 : vector<16x16xf32>
    %53 = vector.extract_strided_slice %16 {offsets = [112, 0], sizes = [16, 8], strides = [1, 1]} : vector<256x8xbf16> to vector<16x8xbf16>
    %c7 = arith.constant 7 : index
    %c0_36 = arith.constant 0 : index
    %c0_37 = arith.constant 0 : index
    %54 = vector.load %arg5[%c7, %c0_36, %c0_37] : memref<16x8x16xbf16, #tpu.memory_space<vmem>>, vector<1x8x16xbf16>
    %55 = vector.shape_cast %54 : vector<1x8x16xbf16> to vector<8x16xbf16>
    %cst_38 = arith.constant dense<0.000000e+00> : vector<16x16xf32>
    %56 = tpu.matmul %53, %55, %cst_38 {dimension_numbers = #tpu.dot_dimension_numbers<[1], [0], [0], [1], [0, 0, 1, 1], [], []>} : vector<16x8xbf16>, vector<8x16xbf16>, vector<16x16xf32> -> vector<16x16xf32>
    %57 = arith.addf %52, %56 : vector<16x16xf32>
    %58 = vector.extract_strided_slice %16 {offsets = [128, 0], sizes = [16, 8], strides = [1, 1]} : vector<256x8xbf16> to vector<16x8xbf16>
    %c8 = arith.constant 8 : index
    %c0_39 = arith.constant 0 : index
    %c0_40 = arith.constant 0 : index
    %59 = vector.load %arg5[%c8, %c0_39, %c0_40] : memref<16x8x16xbf16, #tpu.memory_space<vmem>>, vector<1x8x16xbf16>
    %60 = vector.shape_cast %59 : vector<1x8x16xbf16> to vector<8x16xbf16>
    %cst_41 = arith.constant dense<0.000000e+00> : vector<16x16xf32>
    %61 = tpu.matmul %58, %60, %cst_41 {dimension_numbers = #tpu.dot_dimension_numbers<[1], [0], [0], [1], [0, 0, 1, 1], [], []>} : vector<16x8xbf16>, vector<8x16xbf16>, vector<16x16xf32> -> vector<16x16xf32>
    %62 = arith.addf %57, %61 : vector<16x16xf32>
    %63 = vector.extract_strided_slice %16 {offsets = [144, 0], sizes = [16, 8], strides = [1, 1]} : vector<256x8xbf16> to vector<16x8xbf16>
    %c9 = arith.constant 9 : index
    %c0_42 = arith.constant 0 : index
    %c0_43 = arith.constant 0 : index
    %64 = vector.load %arg5[%c9, %c0_42, %c0_43] : memref<16x8x16xbf16, #tpu.memory_space<vmem>>, vector<1x8x16xbf16>
    %65 = vector.shape_cast %64 : vector<1x8x16xbf16> to vector<8x16xbf16>
    %cst_44 = arith.constant dense<0.000000e+00> : vector<16x16xf32>
    %66 = tpu.matmul %63, %65, %cst_44 {dimension_numbers = #tpu.dot_dimension_numbers<[1], [0], [0], [1], [0, 0, 1, 1], [], []>} : vector<16x8xbf16>, vector<8x16xbf16>, vector<16x16xf32> -> vector<16x16xf32>
    %67 = arith.addf %62, %66 : vector<16x16xf32>
    %68 = vector.extract_strided_slice %16 {offsets = [160, 0], sizes = [16, 8], strides = [1, 1]} : vector<256x8xbf16> to vector<16x8xbf16>
    %c10 = arith.constant 10 : index
    %c0_45 = arith.constant 0 : index
    %c0_46 = arith.constant 0 : index
    %69 = vector.load %arg5[%c10, %c0_45, %c0_46] : memref<16x8x16xbf16, #tpu.memory_space<vmem>>, vector<1x8x16xbf16>
    %70 = vector.shape_cast %69 : vector<1x8x16xbf16> to vector<8x16xbf16>
    %cst_47 = arith.constant dense<0.000000e+00> : vector<16x16xf32>
    %71 = tpu.matmul %68, %70, %cst_47 {dimension_numbers = #tpu.dot_dimension_numbers<[1], [0], [0], [1], [0, 0, 1, 1], [], []>} : vector<16x8xbf16>, vector<8x16xbf16>, vector<16x16xf32> -> vector<16x16xf32>
    %72 = arith.addf %67, %71 : vector<16x16xf32>
    %73 = vector.extract_strided_slice %16 {offsets = [176, 0], sizes = [16, 8], strides = [1, 1]} : vector<256x8xbf16> to vector<16x8xbf16>
    %c11 = arith.constant 11 : index
    %c0_48 = arith.constant 0 : index
    %c0_49 = arith.constant 0 : index
    %74 = vector.load %arg5[%c11, %c0_48, %c0_49] : memref<16x8x16xbf16, #tpu.memory_space<vmem>>, vector<1x8x16xbf16>
    %75 = vector.shape_cast %74 : vector<1x8x16xbf16> to vector<8x16xbf16>
    %cst_50 = arith.constant dense<0.000000e+00> : vector<16x16xf32>
    %76 = tpu.matmul %73, %75, %cst_50 {dimension_numbers = #tpu.dot_dimension_numbers<[1], [0], [0], [1], [0, 0, 1, 1], [], []>} : vector<16x8xbf16>, vector<8x16xbf16>, vector<16x16xf32> -> vector<16x16xf32>
    %77 = arith.addf %72, %76 : vector<16x16xf32>
    %78 = vector.extract_strided_slice %16 {offsets = [192, 0], sizes = [16, 8], strides = [1, 1]} : vector<256x8xbf16> to vector<16x8xbf16>
    %c12 = arith.constant 12 : index
    %c0_51 = arith.constant 0 : index
    %c0_52 = arith.constant 0 : index
    %79 = vector.load %arg5[%c12, %c0_51, %c0_52] : memref<16x8x16xbf16, #tpu.memory_space<vmem>>, vector<1x8x16xbf16>
    %80 = vector.shape_cast %79 : vector<1x8x16xbf16> to vector<8x16xbf16>
    %cst_53 = arith.constant dense<0.000000e+00> : vector<16x16xf32>
    %81 = tpu.matmul %78, %80, %cst_53 {dimension_numbers = #tpu.dot_dimension_numbers<[1], [0], [0], [1], [0, 0, 1, 1], [], []>} : vector<16x8xbf16>, vector<8x16xbf16>, vector<16x16xf32> -> vector<16x16xf32>
    %82 = arith.addf %77, %81 : vector<16x16xf32>
    %83 = vector.extract_strided_slice %16 {offsets = [208, 0], sizes = [16, 8], strides = [1, 1]} : vector<256x8xbf16> to vector<16x8xbf16>
    %c13 = arith.constant 13 : index
    %c0_54 = arith.constant 0 : index
    %c0_55 = arith.constant 0 : index
    %84 = vector.load %arg5[%c13, %c0_54, %c0_55] : memref<16x8x16xbf16, #tpu.memory_space<vmem>>, vector<1x8x16xbf16>
    %85 = vector.shape_cast %84 : vector<1x8x16xbf16> to vector<8x16xbf16>
    %cst_56 = arith.constant dense<0.000000e+00> : vector<16x16xf32>
    %86 = tpu.matmul %83, %85, %cst_56 {dimension_numbers = #tpu.dot_dimension_numbers<[1], [0], [0], [1], [0, 0, 1, 1], [], []>} : vector<16x8xbf16>, vector<8x16xbf16>, vector<16x16xf32> -> vector<16x16xf32>
    %87 = arith.addf %82, %86 : vector<16x16xf32>
    %88 = vector.extract_strided_slice %16 {offsets = [224, 0], sizes = [16, 8], strides = [1, 1]} : vector<256x8xbf16> to vector<16x8xbf16>
    %c14 = arith.constant 14 : index
    %c0_57 = arith.constant 0 : index
    %c0_58 = arith.constant 0 : index
    %89 = vector.load %arg5[%c14, %c0_57, %c0_58] : memref<16x8x16xbf16, #tpu.memory_space<vmem>>, vector<1x8x16xbf16>
    %90 = vector.shape_cast %89 : vector<1x8x16xbf16> to vector<8x16xbf16>
    %cst_59 = arith.constant dense<0.000000e+00> : vector<16x16xf32>
    %91 = tpu.matmul %88, %90, %cst_59 {dimension_numbers = #tpu.dot_dimension_numbers<[1], [0], [0], [1], [0, 0, 1, 1], [], []>} : vector<16x8xbf16>, vector<8x16xbf16>, vector<16x16xf32> -> vector<16x16xf32>
    %92 = arith.addf %87, %91 : vector<16x16xf32>
    %93 = vector.extract_strided_slice %16 {offsets = [240, 0], sizes = [16, 8], strides = [1, 1]} : vector<256x8xbf16> to vector<16x8xbf16>
    %c15 = arith.constant 15 : index
    %c0_60 = arith.constant 0 : index
    %c0_61 = arith.constant 0 : index
    %94 = vector.load %arg5[%c15, %c0_60, %c0_61] : memref<16x8x16xbf16, #tpu.memory_space<vmem>>, vector<1x8x16xbf16>
    %95 = vector.shape_cast %94 : vector<1x8x16xbf16> to vector<8x16xbf16>
    %cst_62 = arith.constant dense<0.000000e+00> : vector<16x16xf32>
    %96 = tpu.matmul %93, %95, %cst_62 {dimension_numbers = #tpu.dot_dimension_numbers<[1], [0], [0], [1], [0, 0, 1, 1], [], []>} : vector<16x8xbf16>, vector<8x16xbf16>, vector<16x16xf32> -> vector<16x16xf32>
    %97 = arith.addf %92, %96 : vector<16x16xf32>
    %98 = vector.broadcast %13 : vector<1x16xf32> to vector<16x16xf32>
    %99 = arith.addf %97, %98 : vector<16x16xf32>
    %cst_63 = arith.constant 0.000000e+00 : f32
    %100 = vector.broadcast %cst_63 : f32 to vector<16x16xf32>
    %101 = arith.cmpf oge, %99, %100 : vector<16x16xf32>
    %cst_64 = arith.constant 0.00999999977 : f32
    %102 = vector.broadcast %cst_64 : f32 to vector<16x16xf32>
    %103 = arith.mulf %102, %99 : vector<16x16xf32>
    %104 = arith.select %101, %99, %103 : vector<16x16xi1>, vector<16x16xf32>
    %105 = arith.truncf %104 : vector<16x16xf32> to vector<16x16xbf16>
    %c0_65 = arith.constant 0 : index
    %c0_66 = arith.constant 0 : index
    %106 = vector.load %arg9[%c0_65, %c0_66] : memref<1x32xf32, #tpu.memory_space<vmem>>, vector<1x32xf32>
    %c0_67 = arith.constant 0 : index
    %c0_68 = arith.constant 0 : index
    %107 = vector.load %arg7[%c0_67, %c0_68] : memref<128x16xbf16, #tpu.memory_space<vmem>>, vector<128x16xbf16>
    %cst_69 = arith.constant dense<0.000000e+00> : vector<128x16xf32>
    %108 = tpu.matmul %107, %105, %cst_69 {dimension_numbers = #tpu.dot_dimension_numbers<[1], [0], [0], [1], [0, 0, 1, 1], [], []>} : vector<128x16xbf16>, vector<16x16xbf16>, vector<128x16xf32> -> vector<128x16xf32>
    %109 = arith.truncf %108 : vector<128x16xf32> to vector<128x16xbf16>
    %cst_70 = arith.constant 0.000000e+00 : f32
    %110 = vector.broadcast %cst_70 : f32 to vector<8x32xf32>
    %111 = vector.extract_strided_slice %109 {offsets = [0, 0], sizes = [8, 16], strides = [1, 1]} : vector<128x16xbf16> to vector<8x16xbf16>
    %c0_71 = arith.constant 0 : index
    %c0_72 = arith.constant 0 : index
    %c0_73 = arith.constant 0 : index
    %112 = vector.load %arg8[%c0_71, %c0_72, %c0_73] : memref<16x16x32xbf16, #tpu.memory_space<vmem>>, vector<1x16x32xbf16>
    %113 = vector.shape_cast %112 : vector<1x16x32xbf16> to vector<16x32xbf16>
    %cst_74 = arith.constant dense<0.000000e+00> : vector<8x32xf32>
    %114 = tpu.matmul %111, %113, %cst_74 {dimension_numbers = #tpu.dot_dimension_numbers<[1], [0], [0], [1], [0, 0, 1, 1], [], []>} : vector<8x16xbf16>, vector<16x32xbf16>, vector<8x32xf32> -> vector<8x32xf32>
    %115 = arith.addf %110, %114 : vector<8x32xf32>
    %116 = vector.extract_strided_slice %109 {offsets = [8, 0], sizes = [8, 16], strides = [1, 1]} : vector<128x16xbf16> to vector<8x16xbf16>
    %c1_75 = arith.constant 1 : index
    %c0_76 = arith.constant 0 : index
    %c0_77 = arith.constant 0 : index
    %117 = vector.load %arg8[%c1_75, %c0_76, %c0_77] : memref<16x16x32xbf16, #tpu.memory_space<vmem>>, vector<1x16x32xbf16>
    %118 = vector.shape_cast %117 : vector<1x16x32xbf16> to vector<16x32xbf16>
    %cst_78 = arith.constant dense<0.000000e+00> : vector<8x32xf32>
    %119 = tpu.matmul %116, %118, %cst_78 {dimension_numbers = #tpu.dot_dimension_numbers<[1], [0], [0], [1], [0, 0, 1, 1], [], []>} : vector<8x16xbf16>, vector<16x32xbf16>, vector<8x32xf32> -> vector<8x32xf32>
    %120 = arith.addf %115, %119 : vector<8x32xf32>
    %121 = vector.extract_strided_slice %109 {offsets = [16, 0], sizes = [8, 16], strides = [1, 1]} : vector<128x16xbf16> to vector<8x16xbf16>
    %c2_79 = arith.constant 2 : index
    %c0_80 = arith.constant 0 : index
    %c0_81 = arith.constant 0 : index
    %122 = vector.load %arg8[%c2_79, %c0_80, %c0_81] : memref<16x16x32xbf16, #tpu.memory_space<vmem>>, vector<1x16x32xbf16>
    %123 = vector.shape_cast %122 : vector<1x16x32xbf16> to vector<16x32xbf16>
    %cst_82 = arith.constant dense<0.000000e+00> : vector<8x32xf32>
    %124 = tpu.matmul %121, %123, %cst_82 {dimension_numbers = #tpu.dot_dimension_numbers<[1], [0], [0], [1], [0, 0, 1, 1], [], []>} : vector<8x16xbf16>, vector<16x32xbf16>, vector<8x32xf32> -> vector<8x32xf32>
    %125 = arith.addf %120, %124 : vector<8x32xf32>
    %126 = vector.extract_strided_slice %109 {offsets = [24, 0], sizes = [8, 16], strides = [1, 1]} : vector<128x16xbf16> to vector<8x16xbf16>
    %c3_83 = arith.constant 3 : index
    %c0_84 = arith.constant 0 : index
    %c0_85 = arith.constant 0 : index
    %127 = vector.load %arg8[%c3_83, %c0_84, %c0_85] : memref<16x16x32xbf16, #tpu.memory_space<vmem>>, vector<1x16x32xbf16>
    %128 = vector.shape_cast %127 : vector<1x16x32xbf16> to vector<16x32xbf16>
    %cst_86 = arith.constant dense<0.000000e+00> : vector<8x32xf32>
    %129 = tpu.matmul %126, %128, %cst_86 {dimension_numbers = #tpu.dot_dimension_numbers<[1], [0], [0], [1], [0, 0, 1, 1], [], []>} : vector<8x16xbf16>, vector<16x32xbf16>, vector<8x32xf32> -> vector<8x32xf32>
    %130 = arith.addf %125, %129 : vector<8x32xf32>
    %131 = vector.extract_strided_slice %109 {offsets = [32, 0], sizes = [8, 16], strides = [1, 1]} : vector<128x16xbf16> to vector<8x16xbf16>
    %c4_87 = arith.constant 4 : index
    %c0_88 = arith.constant 0 : index
    %c0_89 = arith.constant 0 : index
    %132 = vector.load %arg8[%c4_87, %c0_88, %c0_89] : memref<16x16x32xbf16, #tpu.memory_space<vmem>>, vector<1x16x32xbf16>
    %133 = vector.shape_cast %132 : vector<1x16x32xbf16> to vector<16x32xbf16>
    %cst_90 = arith.constant dense<0.000000e+00> : vector<8x32xf32>
    %134 = tpu.matmul %131, %133, %cst_90 {dimension_numbers = #tpu.dot_dimension_numbers<[1], [0], [0], [1], [0, 0, 1, 1], [], []>} : vector<8x16xbf16>, vector<16x32xbf16>, vector<8x32xf32> -> vector<8x32xf32>
    %135 = arith.addf %130, %134 : vector<8x32xf32>
    %136 = vector.extract_strided_slice %109 {offsets = [40, 0], sizes = [8, 16], strides = [1, 1]} : vector<128x16xbf16> to vector<8x16xbf16>
    %c5_91 = arith.constant 5 : index
    %c0_92 = arith.constant 0 : index
    %c0_93 = arith.constant 0 : index
    %137 = vector.load %arg8[%c5_91, %c0_92, %c0_93] : memref<16x16x32xbf16, #tpu.memory_space<vmem>>, vector<1x16x32xbf16>
    %138 = vector.shape_cast %137 : vector<1x16x32xbf16> to vector<16x32xbf16>
    %cst_94 = arith.constant dense<0.000000e+00> : vector<8x32xf32>
    %139 = tpu.matmul %136, %138, %cst_94 {dimension_numbers = #tpu.dot_dimension_numbers<[1], [0], [0], [1], [0, 0, 1, 1], [], []>} : vector<8x16xbf16>, vector<16x32xbf16>, vector<8x32xf32> -> vector<8x32xf32>
    %140 = arith.addf %135, %139 : vector<8x32xf32>
    %141 = vector.extract_strided_slice %109 {offsets = [48, 0], sizes = [8, 16], strides = [1, 1]} : vector<128x16xbf16> to vector<8x16xbf16>
    %c6_95 = arith.constant 6 : index
    %c0_96 = arith.constant 0 : index
    %c0_97 = arith.constant 0 : index
    %142 = vector.load %arg8[%c6_95, %c0_96, %c0_97] : memref<16x16x32xbf16, #tpu.memory_space<vmem>>, vector<1x16x32xbf16>
    %143 = vector.shape_cast %142 : vector<1x16x32xbf16> to vector<16x32xbf16>
    %cst_98 = arith.constant dense<0.000000e+00> : vector<8x32xf32>
    %144 = tpu.matmul %141, %143, %cst_98 {dimension_numbers = #tpu.dot_dimension_numbers<[1], [0], [0], [1], [0, 0, 1, 1], [], []>} : vector<8x16xbf16>, vector<16x32xbf16>, vector<8x32xf32> -> vector<8x32xf32>
    %145 = arith.addf %140, %144 : vector<8x32xf32>
    %146 = vector.extract_strided_slice %109 {offsets = [56, 0], sizes = [8, 16], strides = [1, 1]} : vector<128x16xbf16> to vector<8x16xbf16>
    %c7_99 = arith.constant 7 : index
    %c0_100 = arith.constant 0 : index
    %c0_101 = arith.constant 0 : index
    %147 = vector.load %arg8[%c7_99, %c0_100, %c0_101] : memref<16x16x32xbf16, #tpu.memory_space<vmem>>, vector<1x16x32xbf16>
    %148 = vector.shape_cast %147 : vector<1x16x32xbf16> to vector<16x32xbf16>
    %cst_102 = arith.constant dense<0.000000e+00> : vector<8x32xf32>
    %149 = tpu.matmul %146, %148, %cst_102 {dimension_numbers = #tpu.dot_dimension_numbers<[1], [0], [0], [1], [0, 0, 1, 1], [], []>} : vector<8x16xbf16>, vector<16x32xbf16>, vector<8x32xf32> -> vector<8x32xf32>
    %150 = arith.addf %145, %149 : vector<8x32xf32>
    %151 = vector.extract_strided_slice %109 {offsets = [64, 0], sizes = [8, 16], strides = [1, 1]} : vector<128x16xbf16> to vector<8x16xbf16>
    %c8_103 = arith.constant 8 : index
    %c0_104 = arith.constant 0 : index
    %c0_105 = arith.constant 0 : index
    %152 = vector.load %arg8[%c8_103, %c0_104, %c0_105] : memref<16x16x32xbf16, #tpu.memory_space<vmem>>, vector<1x16x32xbf16>
    %153 = vector.shape_cast %152 : vector<1x16x32xbf16> to vector<16x32xbf16>
    %cst_106 = arith.constant dense<0.000000e+00> : vector<8x32xf32>
    %154 = tpu.matmul %151, %153, %cst_106 {dimension_numbers = #tpu.dot_dimension_numbers<[1], [0], [0], [1], [0, 0, 1, 1], [], []>} : vector<8x16xbf16>, vector<16x32xbf16>, vector<8x32xf32> -> vector<8x32xf32>
    %155 = arith.addf %150, %154 : vector<8x32xf32>
    %156 = vector.extract_strided_slice %109 {offsets = [72, 0], sizes = [8, 16], strides = [1, 1]} : vector<128x16xbf16> to vector<8x16xbf16>
    %c9_107 = arith.constant 9 : index
    %c0_108 = arith.constant 0 : index
    %c0_109 = arith.constant 0 : index
    %157 = vector.load %arg8[%c9_107, %c0_108, %c0_109] : memref<16x16x32xbf16, #tpu.memory_space<vmem>>, vector<1x16x32xbf16>
    %158 = vector.shape_cast %157 : vector<1x16x32xbf16> to vector<16x32xbf16>
    %cst_110 = arith.constant dense<0.000000e+00> : vector<8x32xf32>
    %159 = tpu.matmul %156, %158, %cst_110 {dimension_numbers = #tpu.dot_dimension_numbers<[1], [0], [0], [1], [0, 0, 1, 1], [], []>} : vector<8x16xbf16>, vector<16x32xbf16>, vector<8x32xf32> -> vector<8x32xf32>
    %160 = arith.addf %155, %159 : vector<8x32xf32>
    %161 = vector.extract_strided_slice %109 {offsets = [80, 0], sizes = [8, 16], strides = [1, 1]} : vector<128x16xbf16> to vector<8x16xbf16>
    %c10_111 = arith.constant 10 : index
    %c0_112 = arith.constant 0 : index
    %c0_113 = arith.constant 0 : index
    %162 = vector.load %arg8[%c10_111, %c0_112, %c0_113] : memref<16x16x32xbf16, #tpu.memory_space<vmem>>, vector<1x16x32xbf16>
    %163 = vector.shape_cast %162 : vector<1x16x32xbf16> to vector<16x32xbf16>
    %cst_114 = arith.constant dense<0.000000e+00> : vector<8x32xf32>
    %164 = tpu.matmul %161, %163, %cst_114 {dimension_numbers = #tpu.dot_dimension_numbers<[1], [0], [0], [1], [0, 0, 1, 1], [], []>} : vector<8x16xbf16>, vector<16x32xbf16>, vector<8x32xf32> -> vector<8x32xf32>
    %165 = arith.addf %160, %164 : vector<8x32xf32>
    %166 = vector.extract_strided_slice %109 {offsets = [88, 0], sizes = [8, 16], strides = [1, 1]} : vector<128x16xbf16> to vector<8x16xbf16>
    %c11_115 = arith.constant 11 : index
    %c0_116 = arith.constant 0 : index
    %c0_117 = arith.constant 0 : index
    %167 = vector.load %arg8[%c11_115, %c0_116, %c0_117] : memref<16x16x32xbf16, #tpu.memory_space<vmem>>, vector<1x16x32xbf16>
    %168 = vector.shape_cast %167 : vector<1x16x32xbf16> to vector<16x32xbf16>
    %cst_118 = arith.constant dense<0.000000e+00> : vector<8x32xf32>
    %169 = tpu.matmul %166, %168, %cst_118 {dimension_numbers = #tpu.dot_dimension_numbers<[1], [0], [0], [1], [0, 0, 1, 1], [], []>} : vector<8x16xbf16>, vector<16x32xbf16>, vector<8x32xf32> -> vector<8x32xf32>
    %170 = arith.addf %165, %169 : vector<8x32xf32>
    %171 = vector.extract_strided_slice %109 {offsets = [96, 0], sizes = [8, 16], strides = [1, 1]} : vector<128x16xbf16> to vector<8x16xbf16>
    %c12_119 = arith.constant 12 : index
    %c0_120 = arith.constant 0 : index
    %c0_121 = arith.constant 0 : index
    %172 = vector.load %arg8[%c12_119, %c0_120, %c0_121] : memref<16x16x32xbf16, #tpu.memory_space<vmem>>, vector<1x16x32xbf16>
    %173 = vector.shape_cast %172 : vector<1x16x32xbf16> to vector<16x32xbf16>
    %cst_122 = arith.constant dense<0.000000e+00> : vector<8x32xf32>
    %174 = tpu.matmul %171, %173, %cst_122 {dimension_numbers = #tpu.dot_dimension_numbers<[1], [0], [0], [1], [0, 0, 1, 1], [], []>} : vector<8x16xbf16>, vector<16x32xbf16>, vector<8x32xf32> -> vector<8x32xf32>
    %175 = arith.addf %170, %174 : vector<8x32xf32>
    %176 = vector.extract_strided_slice %109 {offsets = [104, 0], sizes = [8, 16], strides = [1, 1]} : vector<128x16xbf16> to vector<8x16xbf16>
    %c13_123 = arith.constant 13 : index
    %c0_124 = arith.constant 0 : index
    %c0_125 = arith.constant 0 : index
    %177 = vector.load %arg8[%c13_123, %c0_124, %c0_125] : memref<16x16x32xbf16, #tpu.memory_space<vmem>>, vector<1x16x32xbf16>
    %178 = vector.shape_cast %177 : vector<1x16x32xbf16> to vector<16x32xbf16>
    %cst_126 = arith.constant dense<0.000000e+00> : vector<8x32xf32>
    %179 = tpu.matmul %176, %178, %cst_126 {dimension_numbers = #tpu.dot_dimension_numbers<[1], [0], [0], [1], [0, 0, 1, 1], [], []>} : vector<8x16xbf16>, vector<16x32xbf16>, vector<8x32xf32> -> vector<8x32xf32>
    %180 = arith.addf %175, %179 : vector<8x32xf32>
    %181 = vector.extract_strided_slice %109 {offsets = [112, 0], sizes = [8, 16], strides = [1, 1]} : vector<128x16xbf16> to vector<8x16xbf16>
    %c14_127 = arith.constant 14 : index
    %c0_128 = arith.constant 0 : index
    %c0_129 = arith.constant 0 : index
    %182 = vector.load %arg8[%c14_127, %c0_128, %c0_129] : memref<16x16x32xbf16, #tpu.memory_space<vmem>>, vector<1x16x32xbf16>
    %183 = vector.shape_cast %182 : vector<1x16x32xbf16> to vector<16x32xbf16>
    %cst_130 = arith.constant dense<0.000000e+00> : vector<8x32xf32>
    %184 = tpu.matmul %181, %183, %cst_130 {dimension_numbers = #tpu.dot_dimension_numbers<[1], [0], [0], [1], [0, 0, 1, 1], [], []>} : vector<8x16xbf16>, vector<16x32xbf16>, vector<8x32xf32> -> vector<8x32xf32>
    %185 = arith.addf %180, %184 : vector<8x32xf32>
    %186 = vector.extract_strided_slice %109 {offsets = [120, 0], sizes = [8, 16], strides = [1, 1]} : vector<128x16xbf16> to vector<8x16xbf16>
    %c15_131 = arith.constant 15 : index
    %c0_132 = arith.constant 0 : index
    %c0_133 = arith.constant 0 : index
    %187 = vector.load %arg8[%c15_131, %c0_132, %c0_133] : memref<16x16x32xbf16, #tpu.memory_space<vmem>>, vector<1x16x32xbf16>
    %188 = vector.shape_cast %187 : vector<1x16x32xbf16> to vector<16x32xbf16>
    %cst_134 = arith.constant dense<0.000000e+00> : vector<8x32xf32>
    %189 = tpu.matmul %186, %188, %cst_134 {dimension_numbers = #tpu.dot_dimension_numbers<[1], [0], [0], [1], [0, 0, 1, 1], [], []>} : vector<8x16xbf16>, vector<16x32xbf16>, vector<8x32xf32> -> vector<8x32xf32>
    %190 = arith.addf %185, %189 : vector<8x32xf32>
    %191 = vector.broadcast %106 : vector<1x32xf32> to vector<8x32xf32>
    %192 = arith.addf %190, %191 : vector<8x32xf32>
    %cst_135 = arith.constant 0.000000e+00 : f32
    %193 = vector.broadcast %cst_135 : f32 to vector<8x32xf32>
    %194 = arith.cmpf oge, %192, %193 : vector<8x32xf32>
    %cst_136 = arith.constant 0.00999999977 : f32
    %195 = vector.broadcast %cst_136 : f32 to vector<8x32xf32>
    %196 = arith.mulf %195, %192 : vector<8x32xf32>
    %197 = arith.select %194, %192, %196 : vector<8x32xi1>, vector<8x32xf32>
    %198 = arith.truncf %197 : vector<8x32xf32> to vector<8x32xbf16>
    %c0_137 = arith.constant 0 : index
    %c0_138 = arith.constant 0 : index
    %199 = vector.load %arg12[%c0_137, %c0_138] : memref<8x128xf32, #tpu.memory_space<vmem>>, vector<8x128xf32>
    %c0_139 = arith.constant 0 : index
    %c0_140 = arith.constant 0 : index
    %200 = vector.load %arg10[%c0_139, %c0_140] : memref<104x8xbf16, #tpu.memory_space<vmem>>, vector<104x8xbf16>
    %cst_141 = arith.constant dense<0.000000e+00> : vector<104x32xf32>
    %201 = tpu.matmul %200, %198, %cst_141 {dimension_numbers = #tpu.dot_dimension_numbers<[1], [0], [0], [1], [0, 0, 1, 1], [], []>} : vector<104x8xbf16>, vector<8x32xbf16>, vector<104x32xf32> -> vector<104x32xf32>
    %202 = arith.truncf %201 : vector<104x32xf32> to vector<104x32xbf16>
    %cst_142 = arith.constant 0.000000e+00 : f32
    %203 = vector.broadcast %cst_142 : f32 to vector<8x128xf32>
    %204 = vector.extract_strided_slice %202 {offsets = [0, 0], sizes = [8, 32], strides = [1, 1]} : vector<104x32xbf16> to vector<8x32xbf16>
    %c0_143 = arith.constant 0 : index
    %c0_144 = arith.constant 0 : index
    %c0_145 = arith.constant 0 : index
    %205 = vector.load %arg11[%c0_143, %c0_144, %c0_145] : memref<13x32x128xbf16, #tpu.memory_space<vmem>>, vector<1x32x128xbf16>
    %206 = vector.shape_cast %205 : vector<1x32x128xbf16> to vector<32x128xbf16>
    %cst_146 = arith.constant dense<0.000000e+00> : vector<8x128xf32>
    %207 = tpu.matmul %204, %206, %cst_146 {dimension_numbers = #tpu.dot_dimension_numbers<[1], [0], [0], [1], [0, 0, 1, 1], [], []>} : vector<8x32xbf16>, vector<32x128xbf16>, vector<8x128xf32> -> vector<8x128xf32>
    %208 = arith.addf %203, %207 : vector<8x128xf32>
    %209 = vector.extract_strided_slice %202 {offsets = [8, 0], sizes = [8, 32], strides = [1, 1]} : vector<104x32xbf16> to vector<8x32xbf16>
    %c1_147 = arith.constant 1 : index
    %c0_148 = arith.constant 0 : index
    %c0_149 = arith.constant 0 : index
    %210 = vector.load %arg11[%c1_147, %c0_148, %c0_149] : memref<13x32x128xbf16, #tpu.memory_space<vmem>>, vector<1x32x128xbf16>
    %211 = vector.shape_cast %210 : vector<1x32x128xbf16> to vector<32x128xbf16>
    %cst_150 = arith.constant dense<0.000000e+00> : vector<8x128xf32>
    %212 = tpu.matmul %209, %211, %cst_150 {dimension_numbers = #tpu.dot_dimension_numbers<[1], [0], [0], [1], [0, 0, 1, 1], [], []>} : vector<8x32xbf16>, vector<32x128xbf16>, vector<8x128xf32> -> vector<8x128xf32>
    %213 = arith.addf %208, %212 : vector<8x128xf32>
    %214 = vector.extract_strided_slice %202 {offsets = [16, 0], sizes = [8, 32], strides = [1, 1]} : vector<104x32xbf16> to vector<8x32xbf16>
    %c2_151 = arith.constant 2 : index
    %c0_152 = arith.constant 0 : index
    %c0_153 = arith.constant 0 : index
    %215 = vector.load %arg11[%c2_151, %c0_152, %c0_153] : memref<13x32x128xbf16, #tpu.memory_space<vmem>>, vector<1x32x128xbf16>
    %216 = vector.shape_cast %215 : vector<1x32x128xbf16> to vector<32x128xbf16>
    %cst_154 = arith.constant dense<0.000000e+00> : vector<8x128xf32>
    %217 = tpu.matmul %214, %216, %cst_154 {dimension_numbers = #tpu.dot_dimension_numbers<[1], [0], [0], [1], [0, 0, 1, 1], [], []>} : vector<8x32xbf16>, vector<32x128xbf16>, vector<8x128xf32> -> vector<8x128xf32>
    %218 = arith.addf %213, %217 : vector<8x128xf32>
    %219 = vector.extract_strided_slice %202 {offsets = [24, 0], sizes = [8, 32], strides = [1, 1]} : vector<104x32xbf16> to vector<8x32xbf16>
    %c3_155 = arith.constant 3 : index
    %c0_156 = arith.constant 0 : index
    %c0_157 = arith.constant 0 : index
    %220 = vector.load %arg11[%c3_155, %c0_156, %c0_157] : memref<13x32x128xbf16, #tpu.memory_space<vmem>>, vector<1x32x128xbf16>
    %221 = vector.shape_cast %220 : vector<1x32x128xbf16> to vector<32x128xbf16>
    %cst_158 = arith.constant dense<0.000000e+00> : vector<8x128xf32>
    %222 = tpu.matmul %219, %221, %cst_158 {dimension_numbers = #tpu.dot_dimension_numbers<[1], [0], [0], [1], [0, 0, 1, 1], [], []>} : vector<8x32xbf16>, vector<32x128xbf16>, vector<8x128xf32> -> vector<8x128xf32>
    %223 = arith.addf %218, %222 : vector<8x128xf32>
    %224 = vector.extract_strided_slice %202 {offsets = [32, 0], sizes = [8, 32], strides = [1, 1]} : vector<104x32xbf16> to vector<8x32xbf16>
    %c4_159 = arith.constant 4 : index
    %c0_160 = arith.constant 0 : index
    %c0_161 = arith.constant 0 : index
    %225 = vector.load %arg11[%c4_159, %c0_160, %c0_161] : memref<13x32x128xbf16, #tpu.memory_space<vmem>>, vector<1x32x128xbf16>
    %226 = vector.shape_cast %225 : vector<1x32x128xbf16> to vector<32x128xbf16>
    %cst_162 = arith.constant dense<0.000000e+00> : vector<8x128xf32>
    %227 = tpu.matmul %224, %226, %cst_162 {dimension_numbers = #tpu.dot_dimension_numbers<[1], [0], [0], [1], [0, 0, 1, 1], [], []>} : vector<8x32xbf16>, vector<32x128xbf16>, vector<8x128xf32> -> vector<8x128xf32>
    %228 = arith.addf %223, %227 : vector<8x128xf32>
    %229 = vector.extract_strided_slice %202 {offsets = [40, 0], sizes = [8, 32], strides = [1, 1]} : vector<104x32xbf16> to vector<8x32xbf16>
    %c5_163 = arith.constant 5 : index
    %c0_164 = arith.constant 0 : index
    %c0_165 = arith.constant 0 : index
    %230 = vector.load %arg11[%c5_163, %c0_164, %c0_165] : memref<13x32x128xbf16, #tpu.memory_space<vmem>>, vector<1x32x128xbf16>
    %231 = vector.shape_cast %230 : vector<1x32x128xbf16> to vector<32x128xbf16>
    %cst_166 = arith.constant dense<0.000000e+00> : vector<8x128xf32>
    %232 = tpu.matmul %229, %231, %cst_166 {dimension_numbers = #tpu.dot_dimension_numbers<[1], [0], [0], [1], [0, 0, 1, 1], [], []>} : vector<8x32xbf16>, vector<32x128xbf16>, vector<8x128xf32> -> vector<8x128xf32>
    %233 = arith.addf %228, %232 : vector<8x128xf32>
    %234 = vector.extract_strided_slice %202 {offsets = [48, 0], sizes = [8, 32], strides = [1, 1]} : vector<104x32xbf16> to vector<8x32xbf16>
    %c6_167 = arith.constant 6 : index
    %c0_168 = arith.constant 0 : index
    %c0_169 = arith.constant 0 : index
    %235 = vector.load %arg11[%c6_167, %c0_168, %c0_169] : memref<13x32x128xbf16, #tpu.memory_space<vmem>>, vector<1x32x128xbf16>
    %236 = vector.shape_cast %235 : vector<1x32x128xbf16> to vector<32x128xbf16>
    %cst_170 = arith.constant dense<0.000000e+00> : vector<8x128xf32>
    %237 = tpu.matmul %234, %236, %cst_170 {dimension_numbers = #tpu.dot_dimension_numbers<[1], [0], [0], [1], [0, 0, 1, 1], [], []>} : vector<8x32xbf16>, vector<32x128xbf16>, vector<8x128xf32> -> vector<8x128xf32>
    %238 = arith.addf %233, %237 : vector<8x128xf32>
    %239 = vector.extract_strided_slice %202 {offsets = [56, 0], sizes = [8, 32], strides = [1, 1]} : vector<104x32xbf16> to vector<8x32xbf16>
    %c7_171 = arith.constant 7 : index
    %c0_172 = arith.constant 0 : index
    %c0_173 = arith.constant 0 : index
    %240 = vector.load %arg11[%c7_171, %c0_172, %c0_173] : memref<13x32x128xbf16, #tpu.memory_space<vmem>>, vector<1x32x128xbf16>
    %241 = vector.shape_cast %240 : vector<1x32x128xbf16> to vector<32x128xbf16>
    %cst_174 = arith.constant dense<0.000000e+00> : vector<8x128xf32>
    %242 = tpu.matmul %239, %241, %cst_174 {dimension_numbers = #tpu.dot_dimension_numbers<[1], [0], [0], [1], [0, 0, 1, 1], [], []>} : vector<8x32xbf16>, vector<32x128xbf16>, vector<8x128xf32> -> vector<8x128xf32>
    %243 = arith.addf %238, %242 : vector<8x128xf32>
    %244 = vector.extract_strided_slice %202 {offsets = [64, 0], sizes = [8, 32], strides = [1, 1]} : vector<104x32xbf16> to vector<8x32xbf16>
    %c8_175 = arith.constant 8 : index
    %c0_176 = arith.constant 0 : index
    %c0_177 = arith.constant 0 : index
    %245 = vector.load %arg11[%c8_175, %c0_176, %c0_177] : memref<13x32x128xbf16, #tpu.memory_space<vmem>>, vector<1x32x128xbf16>
    %246 = vector.shape_cast %245 : vector<1x32x128xbf16> to vector<32x128xbf16>
    %cst_178 = arith.constant dense<0.000000e+00> : vector<8x128xf32>
    %247 = tpu.matmul %244, %246, %cst_178 {dimension_numbers = #tpu.dot_dimension_numbers<[1], [0], [0], [1], [0, 0, 1, 1], [], []>} : vector<8x32xbf16>, vector<32x128xbf16>, vector<8x128xf32> -> vector<8x128xf32>
    %248 = arith.addf %243, %247 : vector<8x128xf32>
    %249 = vector.extract_strided_slice %202 {offsets = [72, 0], sizes = [8, 32], strides = [1, 1]} : vector<104x32xbf16> to vector<8x32xbf16>
    %c9_179 = arith.constant 9 : index
    %c0_180 = arith.constant 0 : index
    %c0_181 = arith.constant 0 : index
    %250 = vector.load %arg11[%c9_179, %c0_180, %c0_181] : memref<13x32x128xbf16, #tpu.memory_space<vmem>>, vector<1x32x128xbf16>
    %251 = vector.shape_cast %250 : vector<1x32x128xbf16> to vector<32x128xbf16>
    %cst_182 = arith.constant dense<0.000000e+00> : vector<8x128xf32>
    %252 = tpu.matmul %249, %251, %cst_182 {dimension_numbers = #tpu.dot_dimension_numbers<[1], [0], [0], [1], [0, 0, 1, 1], [], []>} : vector<8x32xbf16>, vector<32x128xbf16>, vector<8x128xf32> -> vector<8x128xf32>
    %253 = arith.addf %248, %252 : vector<8x128xf32>
    %254 = vector.extract_strided_slice %202 {offsets = [80, 0], sizes = [8, 32], strides = [1, 1]} : vector<104x32xbf16> to vector<8x32xbf16>
    %c10_183 = arith.constant 10 : index
    %c0_184 = arith.constant 0 : index
    %c0_185 = arith.constant 0 : index
    %255 = vector.load %arg11[%c10_183, %c0_184, %c0_185] : memref<13x32x128xbf16, #tpu.memory_space<vmem>>, vector<1x32x128xbf16>
    %256 = vector.shape_cast %255 : vector<1x32x128xbf16> to vector<32x128xbf16>
    %cst_186 = arith.constant dense<0.000000e+00> : vector<8x128xf32>
    %257 = tpu.matmul %254, %256, %cst_186 {dimension_numbers = #tpu.dot_dimension_numbers<[1], [0], [0], [1], [0, 0, 1, 1], [], []>} : vector<8x32xbf16>, vector<32x128xbf16>, vector<8x128xf32> -> vector<8x128xf32>
    %258 = arith.addf %253, %257 : vector<8x128xf32>
    %259 = vector.extract_strided_slice %202 {offsets = [88, 0], sizes = [8, 32], strides = [1, 1]} : vector<104x32xbf16> to vector<8x32xbf16>
    %c11_187 = arith.constant 11 : index
    %c0_188 = arith.constant 0 : index
    %c0_189 = arith.constant 0 : index
    %260 = vector.load %arg11[%c11_187, %c0_188, %c0_189] : memref<13x32x128xbf16, #tpu.memory_space<vmem>>, vector<1x32x128xbf16>
    %261 = vector.shape_cast %260 : vector<1x32x128xbf16> to vector<32x128xbf16>
    %cst_190 = arith.constant dense<0.000000e+00> : vector<8x128xf32>
    %262 = tpu.matmul %259, %261, %cst_190 {dimension_numbers = #tpu.dot_dimension_numbers<[1], [0], [0], [1], [0, 0, 1, 1], [], []>} : vector<8x32xbf16>, vector<32x128xbf16>, vector<8x128xf32> -> vector<8x128xf32>
    %263 = arith.addf %258, %262 : vector<8x128xf32>
    %264 = vector.extract_strided_slice %202 {offsets = [96, 0], sizes = [8, 32], strides = [1, 1]} : vector<104x32xbf16> to vector<8x32xbf16>
    %c12_191 = arith.constant 12 : index
    %c0_192 = arith.constant 0 : index
    %c0_193 = arith.constant 0 : index
    %265 = vector.load %arg11[%c12_191, %c0_192, %c0_193] : memref<13x32x128xbf16, #tpu.memory_space<vmem>>, vector<1x32x128xbf16>
    %266 = vector.shape_cast %265 : vector<1x32x128xbf16> to vector<32x128xbf16>
    %cst_194 = arith.constant dense<0.000000e+00> : vector<8x128xf32>
    %267 = tpu.matmul %264, %266, %cst_194 {dimension_numbers = #tpu.dot_dimension_numbers<[1], [0], [0], [1], [0, 0, 1, 1], [], []>} : vector<8x32xbf16>, vector<32x128xbf16>, vector<8x128xf32> -> vector<8x128xf32>
    %268 = arith.addf %263, %267 : vector<8x128xf32>
    %269 = arith.addf %268, %199 : vector<8x128xf32>
    %c0_195 = arith.constant 0 : index
    %c0_196 = arith.constant 0 : index
    %c0_197 = arith.constant 0 : index
    %270 = vector.load %arg13[%c0_195, %c0_196, %c0_197] : memref<1x8x128xf32, #tpu.memory_space<vmem>>, vector<1x8x128xf32>
    %271 = vector.shape_cast %270 : vector<1x8x128xf32> to vector<8x128xf32>
    %272 = vector.shape_cast %269 : vector<8x128xf32> to vector<1x8x128xf32>
    tpu.vector_store %arg13[%c0_195, %c0_196, %c0_197], %272 {strides = array<i32>} : memref<1x8x128xf32, #tpu.memory_space<vmem>>, vector<1x8x128xf32>,
    return
  }
  func.func @transform_0(%arg0: i32) -> (i32, i32, i32) {
    %c0_i32 = arith.constant 0 : i32
    %c0_i32_0 = arith.constant 0 : i32
    %c0_i32_1 = arith.constant 0 : i32
    return %arg0, %c0_i32, %c0_i32_0 : i32, i32, i32
  }
  func.func @transform_1(%arg0: i32) -> (i32, i32) {
    %c0_i32 = arith.constant 0 : i32
    %c0_i32_0 = arith.constant 0 : i32
    %c0_i32_1 = arith.constant 0 : i32
    return %c0_i32, %c0_i32_0 : i32, i32
  }
  func.func @transform_2(%arg0: i32) -> (i32, i32) {
    %c0_i32 = arith.constant 0 : i32
    %c0_i32_0 = arith.constant 0 : i32
    %c0_i32_1 = arith.constant 0 : i32
    return %c0_i32, %c0_i32_0 : i32, i32
  }
  func.func @transform_3(%arg0: i32) -> (i32, i32) {
    %c0_i32 = arith.constant 0 : i32
    %c0_i32_0 = arith.constant 0 : i32
    %c0_i32_1 = arith.constant 0 : i32
    return %c0_i32, %c0_i32_0 : i32, i32
  }
  func.func @transform_4(%arg0: i32) -> (i32, i32, i32) {
    %c0_i32 = arith.constant 0 : i32
    %c0_i32_0 = arith.constant 0 : i32
    %c0_i32_1 = arith.constant 0 : i32
    %c0_i32_2 = arith.constant 0 : i32
    return %c0_i32, %c0_i32_0, %c0_i32_1 : i32, i32, i32
  }
  func.func @transform_5(%arg0: i32) -> (i32, i32) {
    %c0_i32 = arith.constant 0 : i32
    %c0_i32_0 = arith.constant 0 : i32
    %c0_i32_1 = arith.constant 0 : i32
    return %c0_i32, %c0_i32_0 : i32, i32
  }
  func.func @transform_6(%arg0: i32) -> (i32, i32) {
    %c0_i32 = arith.constant 0 : i32
    %c0_i32_0 = arith.constant 0 : i32
    %c0_i32_1 = arith.constant 0 : i32
    return %c0_i32, %c0_i32_0 : i32, i32
  }
  func.func @transform_7(%arg0: i32) -> (i32, i32, i32) {
    %c0_i32 = arith.constant 0 : i32
    %c0_i32_0 = arith.constant 0 : i32
    %c0_i32_1 = arith.constant 0 : i32
    %c0_i32_2 = arith.constant 0 : i32
    return %c0_i32, %c0_i32_0, %c0_i32_1 : i32, i32, i32
  }
  func.func @transform_8(%arg0: i32) -> (i32, i32) {
    %c0_i32 = arith.constant 0 : i32
    %c0_i32_0 = arith.constant 0 : i32
    %c0_i32_1 = arith.constant 0 : i32
    return %c0_i32, %c0_i32_0 : i32, i32
  }
  func.func @transform_9(%arg0: i32) -> (i32, i32) {
    %c0_i32 = arith.constant 0 : i32
    %c0_i32_0 = arith.constant 0 : i32
    %c0_i32_1 = arith.constant 0 : i32
    return %c0_i32, %c0_i32_0 : i32, i32
  }
  func.func @transform_10(%arg0: i32) -> (i32, i32, i32) {
    %c0_i32 = arith.constant 0 : i32
    %c0_i32_0 = arith.constant 0 : i32
    %c0_i32_1 = arith.constant 0 : i32
    %c0_i32_2 = arith.constant 0 : i32
    return %c0_i32, %c0_i32_0, %c0_i32_1 : i32, i32, i32
  }
  func.func @transform_11(%arg0: i32) -> (i32, i32) {
    %c0_i32 = arith.constant 0 : i32
    %c0_i32_0 = arith.constant 0 : i32
    %c0_i32_1 = arith.constant 0 : i32
    return %c0_i32, %c0_i32_0 : i32, i32
  }
  func.func @transform_12(%arg0: i32) -> (i32, i32, i32) {
    %c0_i32 = arith.constant 0 : i32
    %c0_i32_0 = arith.constant 0 : i32
    %c0_i32_1 = arith.constant 0 : i32
    return %arg0, %c0_i32, %c0_i32_0 : i32, i32, i32
  }
}

</mosaic_0001>

<bundles_post_ra>
// kernel: squeeze.2
= control target key start
LH: loop header
LB: loop body
LE: loop exit
PB: predicated region body
PF: predicated region fallthrough
CT: control target
= control target key end

     0   :  { %s90_s0 = inlined_call_operand.vmem [shape: f32[2,4], index: 0, kind: input, shape index: {}]   ;;  %s91_s1 = inlined_call_operand.hbm [shape: f32[2,2,2], index: 1, kind: output, shape index: {}]  }
   0x1   :  { %v5_v0 = vld [vmem:[%s90_s0] sm:$0x3] }
   0x2   :  { %2 = vsyncpa [#allocation1], 0  ;;  %6 = vst [vmem:[#allocation3] sm:$0x3] %v5_v0  ;;  %vm8_vm0 = vcmask 15360   ;;  %s63_s0 = smov 126  }
   0x3   :  { %s64_s8 = smov [#allocation0]  }
   0x4   :  { %s31_s9 = sshll.u32 %s64_s8, 4  ;;  %s32_s9 = int_to_ptr.vmem [resolvable:$true] %s31_s9 }
   0x5   :  { %s39_s10 = scalar_lea.vmem %s32_s9, 64  ;;  %p44_p1 = scmp.lt.s32.totalorder %s32_s9, %s32_s9 }
   0x6   :  { %p40_p0 = scmp.ne.s32.totalorder %s32_s9, %s39_s10  ;;  %p45_p2 = scmp.lt.s32.totalorder %s39_s10, %s39_s10 }
   0x8   :  { %p46_p3 = por %p45_p2, %p44_p1 }
   0x9   :  { %v10_v1 = vld [vmem:[#allocation3] sm:$0x3]  }
   0xa   :  { %v7_v2 = vld [vmem:[#allocation3] sm:$0x3]   ;;  %11 = vrot.lane.b32.xlu0 %v10_v1, %s63_s0  ;;  %p47_p4 = pnand %p46_p3, %p40_p0 }
   0xb   :  { %9 = vst.msk [vmem:[#allocation2] ss:$8 sm:$0x3] %vm8_vm0, %v7_v2  }
  0x7c   :  { %v12_v3 = vpop.permute.xlu0 %11  }
  0x7d   :  { %15 = vst.msk [vmem:[#allocation2 + $0x1] ss:$8 sm:$0x3] %vm8_vm0, %v12_v3  }
  0x84   :  { %v19_v4 = vld [vmem:[#allocation2] sm:$0x3]  ;;  %v23_v5 = vld [vmem:[#allocation2 + $0x8] sm:$0x3] }
  0x85   :  { %21 = vst [vmem:[#allocation0] sm:$0x3] %v19_v4  ;;  %26 = vst [vmem:[#allocation0 + $0x2] sm:$0x3] %v23_v5 }
  0x86   :  { %50 = shalt.err (!%p47_p4)
}
  0x87   :  { %s51_s13 = scalar_lea.hbm %s91_s1, 64 }
  0x88   :  { %p52_p5 = scmp.ne.s32.totalorder %s91_s1, %s51_s13  ;;  %p55_p6 = scmp.lt.u32.totalorder %s51_s13, %s91_s1 }
  0x8a   :  { %p57_p7 = pnand %p55_p6, %p52_p5 }
  0x8c   :  { %60 = shalt.err (!%p57_p7)
}
  0x8d   :  { %34 = dma.vmem_to_hbm [thread:$0]  %s32_s9, 64, %s91_s1, [#allocation1]  }
  0x8e   :  { %61 = dma.done.wait [#allocation1], 64  }
  0x8f   :  { %62 = vsyncadd [#allocation1], 4294967232 }
  0x90   :  { %36 = vsyncpa [#allocation1], 1 }

// kernel: discriminator_forward.1
= control target key start
LH: loop header
LB: loop body
LE: loop exit
PB: predicated region body
PF: predicated region fallthrough
CT: control target
= control target key end

     0   :  { %s4844_s21 = smov 0   ;;  %s5444_s0 = inlined_call_operand.vmem [shape: bf16[2,64,96], index: 0, kind: input, shape index: {}]   ;;  %s5445_s1 = inlined_call_operand.vmem [shape: bf16[96,8], index: 1, kind: input, shape index: {}]   ;;  %s5446_s2 = inlined_call_operand.vmem [shape: f32[1,8], index: 2, kind: input, shape index: {}]   ;;  %s5447_s3 = inlined_call_operand.vmem [shape: bf16[256,64], index: 3, kind: input, shape index: {}]   ;;  %s5448_s4 = inlined_call_operand.vmem [shape: bf16[16,8,16], index: 4, kind: input, shape index: {}]   ;;  %s5449_s5 = inlined_call_operand.vmem [shape: f32[1,16], index: 5, kind: input, shape index: {}]   ;;  %s5450_s6 = inlined_call_operand.vmem [shape: bf16[128,16], index: 6, kind: input, shape index: {}]   ;;  %s5451_s7 = inlined_call_operand.vmem [shape: bf16[16,16,32], index: 7, kind: input, shape index: {}]   ;;  %s5452_s8 = inlined_call_operand.vmem [shape: f32[1,32], index: 8, kind: input, shape index: {}]   ;;  %s5453_s9 = inlined_call_operand.vmem [shape: bf16[104,8], index: 9, kind: input, shape index: {}]   ;;  %s5454_s10 = inlined_call_operand.vmem [shape: bf16[13,32,128], index: 10, kind: input, shape index: {}]   ;;  %s5455_s11 = inlined_call_operand.vmem [shape: f32[8,128], index: 11, kind: input, shape index: {}]   ;;  %s5456_s12 = inlined_call_operand.vmem [shape: f32[2,8,128], index: 12, kind: output, shape index: {}]  }
   0x1 LB: > { %s3852_s22 = sadd.s32 4294967295, %s4775_s21   ;;  %p3856_p0 = scmp.ge.s32.totalorder %s4775_s21, 1  ;;  %s4775_s21 = sphi %s4844_s21, %s22_s21  }
   0x2   : > { %p362_p1 = scmp.lt.s32.totalorder %s4775_s21, 3 }
   0x4   : > { %p363_p2 = pnand %p3856_p0, %p362_p1 }
   0x5   : > { %v4686_v0 = vld [vmem:[%s5445_s1] sm:$0xff] (!%p363_p2)   ;;  %p403_p3 = scmp.lt.s32.totalorder (!%p363_p2), %s3852_s22, 1  ;;  %v4687_v1 = vld [vmem:[%s5445_s1 + $0x8] sm:$0xff] (!%p363_p2)   ;;  %v4688_v2 = vld [vmem:[%s5445_s1 + $0x10] sm:$0xff] (!%p363_p2)   ;;  %vm496_vm0 = vcmask (!%p363_p2), 785408   ;;  %vm715_vm1 = vcmask (!%p363_p2), 523264  }
   0x6   : > { %366 = sbr.rel (%p363_p2) target bundleno = 1814 (0x716), region = 68  ;;  %4272 = vmatprep.subr.bf16.mxu0 (!%p363_p2), %v4686_v0  ;;  %v4689_v4 = vld [vmem:[%s5445_s1 + $0x18] sm:$0xff] (!%p363_p2)   ;;  %v4690_v5 = vld [vmem:[%s5445_s1 + $0x20] sm:$0xff] (!%p363_p2)   ;;  %v4691_v6 = vld [vmem:[%s5445_s1 + $0x28] sm:$0xff] (!%p363_p2)   ;;  %vm948_vm2 = vcmask (!%p363_p2), 1043456   ;;  %v4777_v12 = vmov (!%p363_p2), 0.0  }
   0x7   : > { %4273 = vmatpush3.bf16.msra.mxu0 (!%p363_p2), %v4686_v0  ;;  %v4696_v10 = vld [vmem:[%s5447_s3] sm:$0xff] (!%p363_p2)   ;;  %v3918_v51 = vld [vmem:[%s5448_s4 + $0x18] sm:$0xf] (!%p363_p2)  ;;  %v4697_v52 = vld [vmem:[%s5447_s3 + $0x8] sm:$0xff] (!%p363_p2)   ;;  %vm4778_vm11 = vmmov (!%p363_p2), 0   ;;  %vm944_vm12 = vcmask (!%p363_p2), 64512  }
   0x8   : > { %4274 = vmatprep.subr.bf16.mxu0 (!%p363_p2), %v4687_v1  ;;  %4300 = vmatprep.mubr.msk.bf16.mxu1 (!%p363_p2), %vm715_vm1, %v4696_v10  ;;  %v3907_v11 = vld [vmem:[%s5448_s4 + $0x4] sm:$0xf] (!%p363_p2)  ;;  %v3860_v14 = vld [vmem:[%s5446_s2] ss:$0 sm:$0xff] (!%p363_p2)  ;;  %v4698_v53 = vld [vmem:[%s5447_s3 + $0x10] sm:$0xff] (!%p363_p2)   ;;  %v1250_v54 = vsel (!%p363_p2), %vm948_vm2, %v3918_v51, 0 }
   0x9   : > { %v950_v13 = vsel (!%p363_p2), %vm948_vm2, %v3907_v11, 0  ;;  %v4699_v55 = vld [vmem:[%s5447_s3 + $0x18] sm:$0xff] (!%p363_p2)   ;;  %v4700_v56 = vld [vmem:[%s5447_s3 + $0x20] sm:$0xff] (!%p363_p2)   ;;  %v4701_v57 = vld [vmem:[%s5447_s3 + $0x28] sm:$0xff] (!%p363_p2)   ;;  %vm1826_vm13 = vcmask (!%p363_p2), 130048  }
   0xa   : > { %v4702_v58 = vld [vmem:[%s5447_s3 + $0x30] sm:$0xff] (!%p363_p2)   ;;  %v4703_v59 = vld [vmem:[%s5447_s3 + $0x38] sm:$0xff] (!%p363_p2)   ;;  %v4704_v60 = vld [vmem:[%s5447_s3 + $0x40] sm:$0xff] (!%p363_p2)  }
   0xb   : > { %4275 = vmatpush3.bf16.msra.mxu0 (!%p363_p2), %v4687_v1  ;;  %v4705_v61 = vld [vmem:[%s5447_s3 + $0x48] sm:$0xff] (!%p363_p2)   ;;  %v4706_v62 = vld [vmem:[%s5447_s3 + $0x50] sm:$0xff] (!%p363_p2)   ;;  %v4707_v63 = vld [vmem:[%s5447_s3 + $0x58] sm:$0xff] (!%p363_p2)  }
   0xc   : > { %4276 = vmatprep.subr.bf16.mxu0 (!%p363_p2), %v4688_v2  ;;  %v4708_v0 = vld [vmem:[%s5447_s3 + $0x60] sm:$0xff] (!%p363_p2)   ;;  %v4709_v1 = vld [vmem:[%s5447_s3 + $0x68] sm:$0xff] (!%p363_p2)  }
   0xd   : > { %s5458_s22 = smov (!%p403_p3, %s3852_s22), 1 }
   0xe   : > { %s4121_s29 = sshll.u32 %s5458_s22, 5  ;;  %s3859_s13 = sshll.u32 %s5458_s22, 3 }
   0xf   : > { %s407_s14 = scalar_lea.vmem %s5444_s0, %s4121_s29  ;;  %4277 = vmatpush3.bf16.msra.mxu0 %v4688_v2  ;;  %v4710_v2 = vld [vmem:[%s5447_s3 + $0x70] sm:$0xff]   ;;  %s411_s18 = scalar_lea.vmem %s5456_s12, %s3859_s13 }
  0x10   : > { %v4692_v3 = vld [vmem:[%s407_s14] sm:$0xff]   ;;  %4278 = vmatprep.subr.bf16.mxu0 %v4689_v4  ;;  %v4693_v7 = vld [vmem:[%s407_s14 + $0x8] sm:$0xff]   ;;  %v4694_v8 = vld [vmem:[%s407_s14 + $0x10] sm:$0xff]  }
  0x11   : > { %4284 = vmatprep.mubr.msk.bf16.mxu0 %vm496_vm0, %v4692_v3  ;;  %v4695_v9 = vld [vmem:[%s407_s14 + $0x18] sm:$0xff]  }
  0x12   : > { %v4711_v3 = vld [vmem:[%s5447_s3 + $0x78] sm:$0xff]  }
  0x13   : > { %4279 = vmatpush3.bf16.msra.mxu0 %v4689_v4 }
  0x14   : > { %4280 = vmatprep.subr.bf16.mxu0 %v4690_v5 }
  0x17   : > { %4281 = vmatpush3.bf16.msra.mxu0 %v4690_v5  ;;  %v941_v5 = vld [vmem:[%s5448_s4] sm:$0xf] }
  0x18   : > { %4282 = vmatprep.subr.bf16.mxu0 %v4691_v6  ;;  %v997_v10 = vsel %vm948_vm2, %v941_v5, 0  ;;  %v3928_v5 = vld [vmem:[%s5448_s4 + $0x2c] sm:$0xf] }
  0x1b   : > { %4283 = vmatpush3.bf16.msra.mxu0 %v4691_v6 }
  0x1c   : > { %4332 = vmatprep.subr.bf16.mxu0 %v4777_v12 }
  0x1e   : > { %4285 = vmatmul.mubr.msk.bf16.vlgmr.msra.gmra.mrb[0].mxu0 %vm496_vm0, %v4693_v7 }
  0x1f   : > { %4288 = vmatprep.mubr.msk.bf16.mxu0 %vm496_vm0, %v4694_v8  ;;  %4333 = vmatpush3.bf16.msra.mxu0 %v950_v13 }
  0x20   : > { %4338 = vmatprep.subr.bf16.mxu0 %v4777_v12 }
  0x26   : > { %4289 = vmatmul.mubr.msk.bf16.gmra.mrb[4].mxu0 %vm496_vm0, %v4695_v9 }
  0x27   : > { %4334 = vmatprep.mubr.msk.bf16.mxu0 %vm4778_vm11, %v4777_v12 }
  0xf1   : > { %v4286_v15 = vpop.f32.mrb[0].mxu0 }
  0xf2   : > { %v552_v16 = vadd.f32 %v4286_v15, %v3860_v14  ;;  %v543_v17 = vpop.f32.mrb[1].mxu0 }
  0xf3   : > { %v544_v18 = vadd.f32 %v3860_v14, %v543_v17  ;;  %v4287_v19 = vpop.f32.mrb[2].mxu0 }
  0xf4   : > { %v584_v20 = vmul.f32 0.01, %v552_v16  ;;  %v555_v21 = vadd.f32 %v4287_v19, %v3860_v14  ;;  %v546_v22 = vpop.f32.mrb[3].mxu0  ;;  %vm576_vm3 = vcmp.ge.f32.partialorder %v552_v16, 0.0 }
  0xf5   : > { %v582_v23 = vmul.f32 0.01, %v544_v18  ;;  %v547_v24 = vadd.f32 %v3860_v14, %v546_v22  ;;  %vm574_vm5 = vcmp.ge.f32.partialorder %v544_v18, 0.0 }
  0xf6   : > { %vm577_vm4 = vcmp.ge.f32.partialorder %v555_v21, 0.0  ;;  %v585_v25 = vmul.f32 0.01, %v555_v21  ;;  %v592_v27 = vsel %vm576_vm3, %v552_v16, %v584_v20 }
  0xf7   : > { %v583_v26 = vmul.f32 0.01, %v547_v24  ;;  %vm575_vm6 = vcmp.ge.f32.partialorder %v547_v24, 0.0  ;;  %v590_v30 = vsel %vm574_vm5, %v544_v18, %v582_v23 }
  0xf8   : > { %v593_v28 = vsel %vm577_vm4, %v555_v21, %v585_v25  ;;  %v3912_v21 = vld [vmem:[%s5448_s4 + $0xc] sm:$0xf] }
  0xf9   : > { %v4290_v29 = vpop.f32.mrb[4].mxu0  ;;  %v591_v31 = vsel %vm575_vm6, %v547_v24, %v583_v26  ;;  %v599_v32 = vpack.c.bf16 %v593_v28, %v592_v27  ;;  %v1097_v25 = vsel %vm948_vm2, %v3912_v21, 0 }
  0xfa   : > { %v568_v33 = vadd.f32 %v4290_v29, %v3860_v14  ;;  %v559_v34 = vpop.f32.mrb[5].mxu0  ;;  %v598_v35 = vpack.c.bf16 %v591_v31, %v590_v30  ;;  %v3914_v29 = vld [vmem:[%s5448_s4 + $0x10] sm:$0xf] }
  0xfb   : > { %v560_v36 = vadd.f32 %v3860_v14, %v559_v34  ;;  %v4291_v37 = vpop.f32.mrb[6].mxu0  ;;  %v1148_v34 = vsel %vm948_vm2, %v3914_v29, 0 }
  0xfc   : > { %v588_v38 = vmul.f32 0.01, %v568_v33  ;;  %v571_v39 = vadd.f32 %v4291_v37, %v3860_v14  ;;  %v562_v40 = vpop.f32.mrb[7].mxu0  ;;  %4292 = vmatprep.subr.bf16.mxu1 %v598_v35  ;;  %vm580_vm7 = vcmp.ge.f32.partialorder %v568_v33, 0.0 }
  0xfd   : > { %v586_v41 = vmul.f32 0.01, %v560_v36  ;;  %v563_v42 = vadd.f32 %v3860_v14, %v562_v40  ;;  %4293 = vmatpush3.bf16.msra.mxu1 %v598_v35  ;;  %vm578_vm8 = vcmp.ge.f32.partialorder %v560_v36, 0.0  ;;  %v3910_v14 = vld [vmem:[%s5448_s4 + $0x8] sm:$0xf] }
  0xfe   : > { %vm581_vm9 = vcmp.ge.f32.partialorder %v571_v39, 0.0  ;;  %v589_v43 = vmul.f32 0.01, %v571_v39  ;;  %4294 = vmatprep.subr.bf16.mxu1 %v599_v32  ;;  %v596_v45 = vsel %vm580_vm7, %v568_v33, %v588_v38  ;;  %v1046_v19 = vsel %vm948_vm2, %v3910_v14, 0  ;;  %v3922_v33 = vld [vmem:[%s5448_s4 + $0x20] sm:$0xf] }
  0xff   : > { %vm579_vm10 = vcmp.ge.f32.partialorder %v563_v42, 0.0  ;;  %v587_v44 = vmul.f32 0.01, %v563_v42  ;;  %v594_v47 = vsel %vm578_vm8, %v560_v36, %v586_v41  ;;  %v1352_v38 = vsel %vm948_vm2, %v3922_v33, 0  ;;  %v3932_v14 = vld [vmem:[%s5448_s4 + $0x34] sm:$0xf] }
 0x100   : > { %v597_v46 = vsel %vm581_vm9, %v571_v39, %v589_v43  ;;  %v3916_v39 = vld [vmem:[%s5448_s4 + $0x14] sm:$0xf]  ;;  %v3926_v43 = vld [vmem:[%s5448_s4 + $0x28] sm:$0xf] }
 0x101   : > { %4295 = vmatpush3.bf16.msra.mxu1 %v599_v32  ;;  %v595_v48 = vsel %vm579_vm10, %v563_v42, %v587_v44  ;;  %v601_v49 = vpack.c.bf16 %v597_v46, %v596_v45  ;;  %v1199_v44 = vsel %vm948_vm2, %v3916_v39, 0 }
 0x102   : > { %v600_v50 = vpack.c.bf16 %v595_v48, %v594_v47  ;;  %v1454_v48 = vsel %vm948_vm2, %v3926_v43, 0 }
 0x104   : > { %4296 = vmatprep.subr.bf16.mxu1 %v600_v50 }
 0x105   : > { %4297 = vmatpush3.bf16.msra.mxu1 %v600_v50 }
 0x106   : > { %4298 = vmatprep.subr.bf16.mxu1 %v601_v49 }
 0x109   : > { %4299 = vmatpush3.bf16.msra.mxu1 %v601_v49  ;;  %v3920_v49 = vld [vmem:[%s5448_s4 + $0x1c] sm:$0xf] }
 0x10a   : > { %4368 = vmatprep.subr.bf16.mxu1 %v4777_v12 }
 0x10c   : > { %4301 = vmatmul.mubr.msk.bf16.vlgmr.msra.gmra.mrb[0].mxu1 %vm715_vm1, %v4697_v52 }
 0x10d   : > { %4304 = vmatprep.mubr.msk.bf16.mxu1 %vm715_vm1, %v4698_v53  ;;  %4369 = vmatpush3.bf16.msra.mxu1 %v1250_v54  ;;  %v3930_v53 = vld [vmem:[%s5448_s4 + $0x30] sm:$0xf]  ;;  %v1301_v54 = vsel %vm948_vm2, %v3920_v49, 0 }
 0x10e   : > { %4380 = vmatprep.subr.bf16.mxu1 %v4777_v12 }
 0x114   : > { %4305 = vmatmul.mubr.msk.bf16.gmra.mrb[4].mxu1 %vm715_vm1, %v4699_v55 }
 0x115   : > { %4308 = vmatprep.mubr.msk.bf16.mxu1 %vm715_vm1, %v4700_v56 }
 0x11c   : > { %4309 = vmatmul.mubr.msk.bf16.gmra.mrb[8].mxu1 %vm715_vm1, %v4701_v57 }
 0x11d   : > { %4312 = vmatprep.mubr.msk.bf16.mxu1 %vm715_vm1, %v4702_v58  ;;  %v1556_v58 = vsel %vm948_vm2, %v3930_v53, 0 }
 0x124   : > { %4313 = vmatmul.mubr.msk.bf16.gmra.mrb[12].mxu1 %vm715_vm1, %v4703_v59  ;;  %v3924_v59 = vld [vmem:[%s5448_s4 + $0x24] sm:$0xf] }
 0x125   : > { %4316 = vmatprep.mubr.msk.bf16.mxu1 %vm715_vm1, %v4704_v60 }
 0x12c   : > { %4317 = vmatmul.mubr.msk.bf16.gmra.mrb[16].mxu1 %vm715_vm1, %v4705_v61 }
 0x12d   : > { %4320 = vmatprep.mubr.msk.bf16.mxu1 %vm715_vm1, %v4706_v62 }
 0x134   : > { %4321 = vmatmul.mubr.msk.bf16.gmra.mrb[20].mxu1 %vm715_vm1, %v4707_v63  ;;  %v3934_v63 = vld [vmem:[%s5448_s4 + $0x38] sm:$0xf] }
 0x135   : > { %4324 = vmatprep.mubr.msk.bf16.mxu1 %vm715_vm1, %v4708_v0  ;;  %v1403_v0 = vsel %vm948_vm2, %v3924_v59, 0 }
 0x13c   : > { %4325 = vmatmul.mubr.msk.bf16.gmra.mrb[24].mxu1 %vm715_vm1, %v4709_v1 }
 0x13d   : > { %4328 = vmatprep.mubr.msk.bf16.mxu1 %vm715_vm1, %v4710_v2 }
 0x144   : > { %4329 = vmatmul.mubr.msk.bf16.gmra.mrb[28].mxu1 %vm715_vm1, %v4711_v3  ;;  %vm3017_vm1 = vcmask 261120  }
 0x145   : > { %4370 = vmatprep.mubr.msk.bf16.mxu1 %vm4778_vm11, %v4777_v12 }
 0x1df   : > { %v4302_v4 = vpop.f32.mrb[0].mxu1 }
 0x1e0   : > { %v798_v6 = vpop.f32.mrb[1].mxu1 }
 0x1e1   : > { %v4303_v7 = vpop.f32.mrb[2].mxu1 }
 0x1e2   : > { %v926_v8 = vpack.c.bf16 %v4303_v7, %v4302_v4  ;;  %v801_v9 = vpop.f32.mrb[3].mxu1  ;;  %v1658_v4 = vsel %vm948_vm2, %v3934_v63, 0 }
 0x1e3   : > { %v925_v11 = vpack.c.bf16 %v801_v9, %v798_v6  ;;  %v1505_v9 = vsel %vm948_vm2, %v3928_v5, 0 }
 0x1e4   : > { %4335 = vmatmul.mubr.msk.bf16.vlgmr.msra.gmra.mrb[8].mxu0 %vm944_vm12, %v926_v8 }
 0x1e5   : > { %4339 = vmatpush3.bf16.msra.mxu0 %v997_v10  ;;  %4340 = vmatprep.mubr.msk.bf16.mxu0 %vm4778_vm11, %v4777_v12 }
 0x1e6   : > { %4344 = vmatprep.subr.bf16.mxu0 %v4777_v12 }
 0x1e7   : > { %v4306_v13 = vpop.f32.mrb[4].mxu1 }
 0x1e8   : > { %v814_v15 = vpop.f32.mrb[5].mxu1 }
 0x1e9   : > { %v4307_v16 = vpop.f32.mrb[6].mxu1 }
 0x1ea   : > { %v928_v17 = vpack.c.bf16 %v4307_v16, %v4306_v13  ;;  %v817_v18 = vpop.f32.mrb[7].mxu1  ;;  %v3936_v16 = vld [vmem:[%s5448_s4 + $0x3c] sm:$0xf] }
 0x1eb   : > { %v927_v20 = vpack.c.bf16 %v817_v18, %v814_v15  ;;  %v1607_v15 = vsel %vm948_vm2, %v3932_v14, 0  ;;  %v4712_v18 = vld [vmem:[%s5450_s6] sm:$0xff]  }
 0x1ec   : > { %4341 = vmatmul.mubr.msk.bf16.vlgmr.msra.gmra.mrb[12].mxu0 %vm944_vm12, %v925_v11 }
 0x1ed   : > { %4345 = vmatpush3.bf16.msra.mxu0 %v1046_v19  ;;  %4346 = vmatprep.mubr.msk.bf16.mxu0 %vm4778_vm11, %v4777_v12 }
 0x1ee   : > { %4350 = vmatprep.subr.bf16.mxu0 %v4777_v12 }
 0x1ef   : > { %v4310_v22 = vpop.f32.mrb[8].mxu1 }
 0x1f0   : > { %v830_v23 = vpop.f32.mrb[9].mxu1 }
 0x1f1   : > { %v4311_v24 = vpop.f32.mrb[10].mxu1 }
 0x1f2   : > { %v930_v26 = vpack.c.bf16 %v4311_v24, %v4310_v22  ;;  %v833_v27 = vpop.f32.mrb[11].mxu1 }
 0x1f3   : > { %v929_v28 = vpack.c.bf16 %v833_v27, %v830_v23 }
 0x1f4   : > { %4347 = vmatmul.mubr.msk.bf16.vlgmr.msra.gmra.mrb[16].mxu0 %vm944_vm12, %v927_v20 }
 0x1f5   : > { %4351 = vmatpush3.bf16.msra.mxu0 %v1097_v25  ;;  %4352 = vmatprep.mubr.msk.bf16.mxu0 %vm4778_vm11, %v4777_v12 }
 0x1f6   : > { %4356 = vmatprep.subr.bf16.mxu0 %v4777_v12 }
 0x1f7   : > { %v4990_v30 = vpop.f32.mrb[12].mxu1 }
 0x1f8   : > { %v846_v31 = vpop.f32.mrb[13].mxu1 }
 0x1f9   : > { %v4315_v32 = vpop.f32.mrb[14].mxu1 }
 0x1fa   : > { %v932_v35 = vpack.c.bf16 %v4315_v32, %v4990_v30  ;;  %v849_v36 = vpop.f32.mrb[15].mxu1 }
 0x1fb   : > { %v931_v37 = vpack.c.bf16 %v849_v36, %v846_v31 }
 0x1fc   : > { %4353 = vmatmul.mubr.msk.bf16.vlgmr.msra.gmra.mrb[20].mxu0 %vm944_vm12, %v928_v17  ;;  %v1709_v17 = vsel %vm948_vm2, %v3936_v16, 0 }
 0x1fd   : > { %4357 = vmatpush3.bf16.msra.mxu0 %v1148_v34  ;;  %4358 = vmatprep.mubr.msk.bf16.mxu0 %vm4778_vm11, %v4777_v12 }
 0x1fe   : > { %4362 = vmatprep.subr.bf16.mxu0 %v4777_v12  ;;  %4371 = vmatmul.mubr.msk.bf16.vlgmr.msra.gmra.mrb[32].mxu1 %vm944_vm12, %v931_v37 }
 0x1ff   : > { %v5006_v40 = vpop.f32.mrb[16].mxu1  ;;  %4381 = vmatpush3.bf16.msra.mxu1 %v1352_v38  ;;  %4382 = vmatprep.mubr.msk.bf16.mxu1 %vm4778_vm11, %v4777_v12 }
 0x200   : > { %v862_v41 = vpop.f32.mrb[17].mxu1  ;;  %4392 = vmatprep.subr.bf16.mxu1 %v4777_v12 }
 0x201   : > { %v4319_v42 = vpop.f32.mrb[18].mxu1 }
 0x202   : > { %v934_v45 = vpack.c.bf16 %v4319_v42, %v5006_v40  ;;  %v865_v46 = vpop.f32.mrb[19].mxu1 }
 0x203   : > { %v933_v47 = vpack.c.bf16 %v865_v46, %v862_v41 }
 0x204   : > { %4359 = vmatmul.mubr.msk.bf16.vlgmr.msra.gmra.mrb[24].mxu0 %vm944_vm12, %v929_v28 }
 0x205   : > { %4363 = vmatpush3.bf16.msra.mxu0 %v1199_v44  ;;  %4364 = vmatprep.mubr.msk.bf16.mxu0 %vm4778_vm11, %v4777_v12 }
 0x206   : > { %4374 = vmatprep.subr.bf16.mxu0 %v4777_v12  ;;  %4383 = vmatmul.mubr.msk.bf16.vlgmr.msra.gmra.mrb[36].mxu1 %vm944_vm12, %v933_v47 }
 0x207   : > { %v4322_v50 = vpop.f32.mrb[20].mxu1  ;;  %4393 = vmatpush3.bf16.msra.mxu1 %v1454_v48  ;;  %4394 = vmatprep.mubr.msk.bf16.mxu1 %vm4778_vm11, %v4777_v12 }
 0x208   : > { %v878_v51 = vpop.f32.mrb[21].mxu1  ;;  %4404 = vmatprep.subr.bf16.mxu1 %v4777_v12 }
 0x209   : > { %v4323_v52 = vpop.f32.mrb[22].mxu1 }
 0x20a   : > { %v936_v55 = vpack.c.bf16 %v4323_v52, %v4322_v50  ;;  %v881_v56 = vpop.f32.mrb[23].mxu1 }
 0x20b   : > { %v935_v57 = vpack.c.bf16 %v881_v56, %v878_v51 }
 0x20c   : > { %4365 = vmatmul.mubr.msk.bf16.vlgmr.msra.gmra.mrb[28].mxu0 %vm944_vm12, %v930_v26 }
 0x20d   : > { %4375 = vmatpush3.bf16.msra.mxu0 %v1301_v54  ;;  %4376 = vmatprep.mubr.msk.bf16.mxu0 %vm4778_vm11, %v4777_v12 }
 0x20e   : > { %4386 = vmatprep.subr.bf16.mxu0 %v4777_v12  ;;  %4395 = vmatmul.mubr.msk.bf16.vlgmr.msra.gmra.mrb[40].mxu1 %vm944_vm12, %v935_v57 }
 0x20f   : > { %v4326_v60 = vpop.f32.mrb[24].mxu1  ;;  %4405 = vmatpush3.bf16.msra.mxu1 %v1556_v58  ;;  %4406 = vmatprep.mubr.msk.bf16.mxu1 %vm4778_vm11, %v4777_v12 }
 0x210   : > { %v894_v61 = vpop.f32.mrb[25].mxu1  ;;  %4416 = vmatprep.subr.bf16.mxu1 %v4777_v12 }
 0x211   : > { %v4327_v62 = vpop.f32.mrb[26].mxu1 }
 0x212   : > { %v938_v1 = vpack.c.bf16 %v4327_v62, %v4326_v60  ;;  %v897_v2 = vpop.f32.mrb[27].mxu1 }
 0x213   : > { %v937_v3 = vpack.c.bf16 %v897_v2, %v894_v61 }
 0x214   : > { %4377 = vmatmul.mubr.msk.bf16.vlgmr.msra.gmra.mrb[32].mxu0 %vm944_vm12, %v932_v35 }
 0x215   : > { %4387 = vmatpush3.bf16.msra.mxu0 %v1403_v0  ;;  %4388 = vmatprep.mubr.msk.bf16.mxu0 %vm4778_vm11, %v4777_v12 }
 0x216   : > { %4398 = vmatprep.subr.bf16.mxu0 %v4777_v12  ;;  %4407 = vmatmul.mubr.msk.bf16.vlgmr.msra.gmra.mrb[44].mxu1 %vm944_vm12, %v937_v3 }
 0x217   : > { %v4330_v6 = vpop.f32.mrb[28].mxu1  ;;  %4417 = vmatpush3.bf16.msra.mxu1 %v1658_v4  ;;  %4418 = vmatprep.mubr.msk.bf16.mxu1 %vm4778_vm11, %v4777_v12 }
 0x218   : > { %v910_v7 = vpop.f32.mrb[29].mxu1 }
 0x219   : > { %v4331_v8 = vpop.f32.mrb[30].mxu1 }
 0x21a   : > { %v940_v10 = vpack.c.bf16 %v4331_v8, %v4330_v6  ;;  %v913_v11 = vpop.f32.mrb[31].mxu1 }
 0x21b   : > { %v939_v13 = vpack.c.bf16 %v913_v11, %v910_v7 }
 0x21c   : > { %4389 = vmatmul.mubr.msk.bf16.vlgmr.msra.gmra.mrb[36].mxu0 %vm944_vm12, %v934_v45 }
 0x21d   : > { %4399 = vmatpush3.bf16.msra.mxu0 %v1505_v9  ;;  %4400 = vmatprep.mubr.msk.bf16.mxu0 %vm4778_vm11, %v4777_v12 }
 0x21e   : > { %4410 = vmatprep.subr.bf16.mxu0 %v4777_v12  ;;  %4419 = vmatmul.mubr.msk.bf16.vlgmr.msra.gmra.mrb[48].mxu1 %vm944_vm12, %v939_v13 }
 0x21f   : > { %4430 = vmatprep.mubr.msk.bf16.mxu1 %vm1826_vm13, %v4712_v18 }
 0x224   : > { %4401 = vmatmul.mubr.msk.bf16.vlgmr.msra.gmra.mrb[40].mxu0 %vm944_vm12, %v936_v55 }
 0x225   : > { %4411 = vmatpush3.bf16.msra.mxu0 %v1607_v15  ;;  %4412 = vmatprep.mubr.msk.bf16.mxu0 %vm4778_vm11, %v4777_v12 }
 0x226   : > { %4422 = vmatprep.subr.bf16.mxu0 %v4777_v12 }
 0x22c   : > { %4413 = vmatmul.mubr.msk.bf16.vlgmr.msra.gmra.mrb[44].mxu0 %vm944_vm12, %v938_v1 }
 0x22d   : > { %4423 = vmatpush3.bf16.msra.mxu0 %v1709_v17  ;;  %4424 = vmatprep.mubr.msk.bf16.mxu0 %vm4778_vm11, %v4777_v12 }
 0x22e   : > { %4446 = vmatprep.subr.bf16.mxu0 %v4777_v12 }
 0x234   : > { %4425 = vmatmul.mubr.msk.bf16.vlgmr.msra.gmra.mrb[48].mxu0 %vm944_vm12, %v940_v10 }
 0x235   : > { %4448 = vmatprep.mubr.msk.bf16.mxu0 %vm4778_vm11, %v4777_v12 }
 0x2b7   : > { %v986_v19 = vpop.f32.mrb[8].mxu0 }
 0x2b8   : > { %v4336_v20 = vpop.f32.mrb[9].mxu0 }
 0x2b9   : > { %v989_v21 = vpop.f32.mrb[10].mxu0 }
 0x2ba   : > { %v4337_v22 = vpop.f32.mrb[11].mxu0 }
 0x2bf   : > { %v1033_v23 = vpop.f32.mrb[12].mxu0 }
 0x2c0   : > { %v1034_v24 = vadd.f32 %v1033_v23, %v986_v19  ;;  %v4342_v25 = vpop.f32.mrb[13].mxu0 }
 0x2c1   : > { %v1036_v26 = vpop.f32.mrb[14].mxu0 }
 0x2c2   : > { %v1037_v27 = vadd.f32 %v1036_v26, %v989_v21  ;;  %v4343_v28 = vpop.f32.mrb[15].mxu0 }
 0x2c7   : > { %v1082_v29 = vpop.f32.mrb[16].mxu0 }
 0x2c8   : > { %v1089_v30 = vadd.f32 %v1082_v29, %v1034_v24  ;;  %v4348_v31 = vpop.f32.mrb[17].mxu0 }
 0x2c9   : > { %v1085_v32 = vpop.f32.mrb[18].mxu0 }
 0x2ca   : > { %v1090_v33 = vadd.f32 %v1085_v32, %v1037_v27  ;;  %v4349_v34 = vpop.f32.mrb[19].mxu0 }
 0x2cf   : > { %v1133_v35 = vpop.f32.mrb[20].mxu0 }
 0x2d0   : > { %v1140_v36 = vadd.f32 %v1133_v35, %v1089_v30  ;;  %v4354_v37 = vpop.f32.mrb[21].mxu0 }
 0x2d1   : > { %v1136_v38 = vpop.f32.mrb[22].mxu0  ;;  %v1286_v39 = vpop.f32.mrb[32].mxu1 }
 0x2d2   : > { %v1141_v40 = vadd.f32 %v1136_v38, %v1090_v33  ;;  %v4355_v41 = vpop.f32.mrb[23].mxu0  ;;  %v4372_v42 = vpop.f32.mrb[33].mxu1 }
 0x2d3   : > { %v1289_v43 = vpop.f32.mrb[34].mxu1 }
 0x2d4   : > { %v4373_v44 = vpop.f32.mrb[35].mxu1 }
 0x2d5   : > { %v3938_v44 = vld [vmem:[%s5449_s5] ss:$0 sm:$0xff] }
 0x2d7   : > { %v1184_v45 = vpop.f32.mrb[24].mxu0 }
 0x2d8   : > { %v1191_v46 = vadd.f32 %v1184_v45, %v1140_v36  ;;  %v4360_v47 = vpop.f32.mrb[25].mxu0 }
 0x2d9   : > { %v1187_v48 = vpop.f32.mrb[26].mxu0  ;;  %v1388_v49 = vpop.f32.mrb[36].mxu1 }
 0x2da   : > { %v1192_v50 = vadd.f32 %v1187_v48, %v1141_v40  ;;  %v4361_v51 = vpop.f32.mrb[27].mxu0  ;;  %v4384_v52 = vpop.f32.mrb[37].mxu1 }
 0x2db   : > { %v1391_v53 = vpop.f32.mrb[38].mxu1 }
 0x2dc   : > { %v4385_v54 = vpop.f32.mrb[39].mxu1 }
 0x2df   : > { %v1235_v55 = vpop.f32.mrb[28].mxu0 }
 0x2e0   : > { %v1242_v56 = vadd.f32 %v1235_v55, %v1191_v46  ;;  %v4366_v57 = vpop.f32.mrb[29].mxu0 }
 0x2e1   : > { %v1238_v58 = vpop.f32.mrb[30].mxu0  ;;  %v1490_v59 = vpop.f32.mrb[40].mxu1 }
 0x2e2   : > { %v1293_v60 = vadd.f32 %v1286_v39, %v1242_v56  ;;  %v1243_v61 = vadd.f32 %v1238_v58, %v1192_v50  ;;  %v4367_v62 = vpop.f32.mrb[31].mxu0  ;;  %v4396_v63 = vpop.f32.mrb[41].mxu1  ;;  %v4713_v58 = vld [vmem:[%s5450_s6 + $0x8] sm:$0xff]  }
 0x2e3   : > { %v1493_v0 = vpop.f32.mrb[42].mxu1  ;;  %v4717_v62 = vld [vmem:[%s5450_s6 + $0x28] sm:$0xff]   ;;  %v4718_v63 = vld [vmem:[%s5450_s6 + $0x30] sm:$0xff]  }
 0x2e4   : > { %v1294_v1 = vadd.f32 %v1289_v43, %v1243_v61  ;;  %v4397_v2 = vpop.f32.mrb[43].mxu1  ;;  %v4716_v61 = vld [vmem:[%s5450_s6 + $0x20] sm:$0xff]  }
 0x2e5   : > { %v4721_v2 = vld [vmem:[%s5451_s7 + $0x20] sm:$0xff]  }
 0x2e7   : > { %v1337_v3 = vpop.f32.mrb[32].mxu0 }
 0x2e8   : > { %v1344_v4 = vadd.f32 %v1337_v3, %v1293_v60  ;;  %v4378_v5 = vpop.f32.mrb[33].mxu0  ;;  %v4715_v60 = vld [vmem:[%s5450_s6 + $0x18] sm:$0xff]  }
 0x2e9   : > { %v1340_v6 = vpop.f32.mrb[34].mxu0  ;;  %v1592_v7 = vpop.f32.mrb[44].mxu1 }
 0x2ea   : > { %v1395_v8 = vadd.f32 %v1388_v49, %v1344_v4  ;;  %v1345_v9 = vadd.f32 %v1340_v6, %v1294_v1  ;;  %v4379_v10 = vpop.f32.mrb[35].mxu0  ;;  %v4408_v11 = vpop.f32.mrb[45].mxu1  ;;  %v4720_v1 = vld [vmem:[%s5451_s7 + $0x8] sm:$0xff]  }
 0x2eb   : > { %v1595_v13 = vpop.f32.mrb[46].mxu1  ;;  %4447 = vmatpush3.bf16.msra.mxu0 %v4720_v1 }
 0x2ec   : > { %v1396_v14 = vadd.f32 %v1391_v53, %v1345_v9  ;;  %v4409_v15 = vpop.f32.mrb[47].mxu1  ;;  %4452 = vmatprep.subr.bf16.mxu0 %v4777_v12  ;;  %v4722_v9 = vld [vmem:[%s5451_s7] sm:$0xff]  }
 0x2ef   : > { %v1439_v16 = vpop.f32.mrb[36].mxu0 }
 0x2f0   : > { %v1446_v17 = vadd.f32 %v1439_v16, %v1395_v8  ;;  %v4390_v18 = vpop.f32.mrb[37].mxu0 }
 0x2f1   : > { %v1442_v19 = vpop.f32.mrb[38].mxu0  ;;  %v1694_v20 = vpop.f32.mrb[48].mxu1 }
 0x2f2   : > { %v1497_v21 = vadd.f32 %v1490_v59, %v1446_v17  ;;  %v1447_v22 = vadd.f32 %v1442_v19, %v1396_v14  ;;  %v4391_v23 = vpop.f32.mrb[39].mxu0  ;;  %v4420_v24 = vpop.f32.mrb[49].mxu1  ;;  %v4714_v59 = vld [vmem:[%s5450_s6 + $0x10] sm:$0xff]  }
 0x2f3   : > { %v1697_v25 = vpop.f32.mrb[50].mxu1  ;;  %v4725_v17 = vld [vmem:[%s5451_s7 + $0x30] sm:$0xff]  }
 0x2f4   : > { %v1498_v26 = vadd.f32 %v1493_v0, %v1447_v22  ;;  %v4421_v27 = vpop.f32.mrb[51].mxu1  ;;  %v4719_v0 = vld [vmem:[%s5450_s6 + $0x38] sm:$0xff]   ;;  %v4723_v19 = vld [vmem:[%s5451_s7 + $0x10] sm:$0xff]  }
 0x2f5   : > { %v4724_v27 = vld [vmem:[%s5451_s7 + $0x18] sm:$0xff]  }
 0x2f7   : > { %v1541_v28 = vpop.f32.mrb[40].mxu0 }
 0x2f8   : > { %v1548_v29 = vadd.f32 %v1541_v28, %v1497_v21  ;;  %v4402_v30 = vpop.f32.mrb[41].mxu0 }
 0x2f9   : > { %v1544_v31 = vpop.f32.mrb[42].mxu0 }
 0x2fa   : > { %v1599_v32 = vadd.f32 %v1592_v7, %v1548_v29  ;;  %v1549_v33 = vadd.f32 %v1544_v31, %v1498_v26  ;;  %v4403_v34 = vpop.f32.mrb[43].mxu0  ;;  %v4729_v31 = vld [vmem:[%s5451_s7 + $0x50] sm:$0xff]  }
 0x2fc   : > { %v1600_v35 = vadd.f32 %v1595_v13, %v1549_v33 }
 0x2ff   : > { %v1643_v36 = vpop.f32.mrb[44].mxu0 }
 0x300   : > { %v1650_v37 = vadd.f32 %v1643_v36, %v1599_v32  ;;  %v4414_v38 = vpop.f32.mrb[45].mxu0 }
 0x301   : > { %v1646_v39 = vpop.f32.mrb[46].mxu0  ;;  %v4728_v38 = vld [vmem:[%s5451_s7 + $0x38] sm:$0xff]  }
 0x302   : > { %v1701_v40 = vadd.f32 %v1694_v20, %v1650_v37  ;;  %v1651_v41 = vadd.f32 %v1646_v39, %v1600_v35  ;;  %v4415_v42 = vpop.f32.mrb[47].mxu0  ;;  %v4726_v35 = vld [vmem:[%s5451_s7 + $0x28] sm:$0xff]   ;;  %v4731_v37 = vld [vmem:[%s5451_s7 + $0x60] sm:$0xff]  }
 0x304   : > { %v1702_v43 = vadd.f32 %v1697_v25, %v1651_v41  ;;  %v4727_v25 = vld [vmem:[%s5451_s7 + $0x40] sm:$0xff]   ;;  %v4730_v41 = vld [vmem:[%s5451_s7 + $0x48] sm:$0xff]  }
 0x307   : > { %v1745_v45 = vpop.f32.mrb[48].mxu0 }
 0x308   : > { %v1752_v46 = vadd.f32 %v1745_v45, %v1701_v40  ;;  %v4426_v47 = vpop.f32.mrb[49].mxu0  ;;  %v4733_v40 = vld [vmem:[%s5451_s7 + $0x70] sm:$0xff]   ;;  %v4734_v45 = vld [vmem:[%s5451_s7 + $0x68] sm:$0xff]  }
 0x309   : > { %v1748_v48 = vpop.f32.mrb[50].mxu0  ;;  %v4735_v47 = vld [vmem:[%s5451_s7 + $0x78] sm:$0xff]  }
 0x30a   : > { %v1760_v49 = vadd.f32 %v3938_v44, %v1752_v46  ;;  %v1753_v50 = vadd.f32 %v1748_v48, %v1702_v43  ;;  %v4427_v51 = vpop.f32.mrb[51].mxu0  ;;  %v4732_v43 = vld [vmem:[%s5451_s7 + $0x58] sm:$0xff]  }
 0x30c   : > { %v1764_v52 = vmul.f32 0.01, %v1760_v49  ;;  %v1761_v53 = vadd.f32 %v3938_v44, %v1753_v50  ;;  %vm1762_vm14 = vcmp.ge.f32.partialorder %v1760_v49, 0.0 }
 0x30e   : > { %vm1763_vm15 = vcmp.ge.f32.partialorder %v1761_v53, 0.0  ;;  %v1765_v54 = vmul.f32 0.01, %v1761_v53  ;;  %v1766_v55 = vsel %vm1762_vm14, %v1760_v49, %v1764_v52 }
 0x310   : > { %v1767_v56 = vsel %vm1763_vm15, %v1761_v53, %v1765_v54 }
 0x311   : > { %v1768_v57 = vpack.c.bf16 %v1767_v56, %v1766_v55 }
 0x313   : > { %4428 = vmatprep.subr.bf16.mxu1 %v1768_v57 }
 0x314   : > { %4429 = vmatpush3.bf16.msra.mxu1 %v1768_v57 }
 0x315   : > { %4470 = vmatprep.subr.bf16.mxu1 %v4777_v12 }
 0x317   : > { %4431 = vmatmul.mubr.msk.bf16.vlgmr.msra.gmra.mrb[52].mxu1 %vm1826_vm13, %v4713_v58 }
 0x318   : > { %4434 = vmatprep.mubr.msk.bf16.mxu1 %vm1826_vm13, %v4714_v59  ;;  %4471 = vmatpush3.bf16.msra.mxu1 %v4721_v2 }
 0x319   : > { %4482 = vmatprep.subr.bf16.mxu1 %v4777_v12 }
 0x31f   : > { %4435 = vmatmul.mubr.msk.bf16.gmra.mrb[56].mxu1 %vm1826_vm13, %v4715_v60 }
 0x320   : > { %4438 = vmatprep.mubr.msk.bf16.mxu1 %vm1826_vm13, %v4716_v61 }
 0x327   : > { %4439 = vmatmul.mubr.msk.bf16.gmra.mrb[60].mxu1 %vm1826_vm13, %v4717_v62 }
 0x328   : > { %4442 = vmatprep.mubr.msk.bf16.mxu1 %vm1826_vm13, %v4718_v63 }
 0x32f   : > { %4443 = vmatmul.mubr.msk.bf16.gmra.mrb[64].mxu1 %vm1826_vm13, %v4719_v0 }
 0x330   : > { %4472 = vmatprep.mubr.msk.bf16.mxu1 %vm4778_vm11, %v4777_v12 }
 0x3ea   : > { %v4432_v3 = vpop.f32.mrb[52].mxu1 }
 0x3eb   : > { %v1885_v4 = vpop.f32.mrb[53].mxu1 }
 0x3ec   : > { %v4433_v5 = vpop.f32.mrb[54].mxu1 }
 0x3ed   : > { %v1949_v6 = vpack.c.bf16 %v4433_v5, %v4432_v3  ;;  %v1888_v7 = vpop.f32.mrb[55].mxu1 }
 0x3ee   : > { %v1948_v8 = vpack.c.bf16 %v1888_v7, %v1885_v4 }
 0x3ef   : > { %v2118_v36 = vrot.slane %v1949_v6, 4 }
 0x3f0   : > { %v1962_v10 = vrot.slane %v1948_v8, 4 }
 0x3f2   : > { %4449 = vmatmul.mubr.msk.bf16.vlgmr.msra.gmra.mrb[52].mxu0 %vm1826_vm13, %v1962_v10  ;;  %v4436_v11 = vpop.f32.mrb[56].mxu1 }
 0x3f3   : > { %4453 = vmatpush3.bf16.msra.mxu0 %v4722_v9  ;;  %4454 = vmatprep.mubr.msk.bf16.mxu0 %vm4778_vm11, %v4777_v12  ;;  %v1901_v13 = vpop.f32.mrb[57].mxu1 }
 0x3f4   : > { %v4437_v14 = vpop.f32.mrb[58].mxu1  ;;  %4458 = vmatprep.subr.bf16.mxu0 %v4777_v12 }
 0x3f5   : > { %v5137_v15 = vpack.c.bf16 %v4437_v14, %v4436_v11  ;;  %v1904_v16 = vpop.f32.mrb[59].mxu1 }
 0x3f6   : > { %v1950_v18 = vpack.c.bf16 %v1904_v16, %v1901_v13 }
 0x3f7   : > { %v2334_v42 = vrot.slane %v5137_v15, 4 }
 0x3f8   : > { %4473 = vmatmul.mubr.msk.bf16.vlgmr.msra.gmra.mrb[68].mxu1 %vm1826_vm13, %v1950_v18  ;;  %v2226_v39 = vrot.slane %v1950_v18, 4 }
 0x3f9   : > { %4483 = vmatpush3.bf16.msra.mxu1 %v4725_v17  ;;  %4484 = vmatprep.mubr.msk.bf16.mxu1 %vm4778_vm11, %v4777_v12 }
 0x3fa   : > { %4455 = vmatmul.mubr.msk.bf16.vlgmr.msra.gmra.mrb[56].mxu0 %vm1826_vm13, %v1948_v8  ;;  %v4440_v20 = vpop.f32.mrb[60].mxu1  ;;  %4494 = vmatprep.subr.bf16.mxu1 %v4777_v12 }
 0x3fb   : > { %4459 = vmatpush3.bf16.msra.mxu0 %v4723_v19  ;;  %4460 = vmatprep.mubr.msk.bf16.mxu0 %vm4778_vm11, %v4777_v12  ;;  %v1917_v21 = vpop.f32.mrb[61].mxu1 }
 0x3fc   : > { %4464 = vmatprep.subr.bf16.mxu0 %v4777_v12  ;;  %v4441_v22 = vpop.f32.mrb[62].mxu1 }
 0x3fd   : > { %v5153_v23 = vpack.c.bf16 %v4441_v22, %v4440_v20  ;;  %v1920_v24 = vpop.f32.mrb[63].mxu1 }
 0x3fe   : > { %v1952_v26 = vpack.c.bf16 %v1920_v24, %v1917_v21 }
 0x3ff   : > { %v2550_v46 = vrot.slane %v5153_v23, 4 }
 0x400   : > { %4485 = vmatmul.mubr.msk.bf16.vlgmr.msra.gmra.mrb[72].mxu1 %vm1826_vm13, %v5137_v15  ;;  %v2442_v44 = vrot.slane %v1952_v26, 4 }
 0x401   : > { %4495 = vmatpush3.bf16.msra.mxu1 %v4727_v25  ;;  %4496 = vmatprep.mubr.msk.bf16.mxu1 %vm4778_vm11, %v4777_v12 }
 0x402   : > { %4461 = vmatmul.mubr.msk.bf16.vlgmr.msra.gmra.mrb[60].mxu0 %vm1826_vm13, %v1949_v6  ;;  %4506 = vmatprep.subr.bf16.mxu1 %v4777_v12  ;;  %v4444_v28 = vpop.f32.mrb[64].mxu1 }
 0x403   : > { %4465 = vmatpush3.bf16.msra.mxu0 %v4724_v27  ;;  %4466 = vmatprep.mubr.msk.bf16.mxu0 %vm4778_vm11, %v4777_v12  ;;  %v1933_v29 = vpop.f32.mrb[65].mxu1 }
 0x404   : > { %4476 = vmatprep.subr.bf16.mxu0 %v4777_v12  ;;  %v4445_v30 = vpop.f32.mrb[66].mxu1 }
 0x405   : > { %v1955_v32 = vpack.c.bf16 %v4445_v30, %v4444_v28  ;;  %v1936_v33 = vpop.f32.mrb[67].mxu1 }
 0x406   : > { %v1954_v34 = vpack.c.bf16 %v1936_v33, %v1933_v29 }
 0x407   : > { %v2766_v49 = vrot.slane %v1955_v32, 4 }
 0x408   : > { %4497 = vmatmul.mubr.msk.bf16.vlgmr.msra.gmra.mrb[76].mxu1 %vm1826_vm13, %v1952_v26  ;;  %v2658_v48 = vrot.slane %v1954_v34, 4 }
 0x409   : > { %4507 = vmatpush3.bf16.msra.mxu1 %v4729_v31  ;;  %4508 = vmatprep.mubr.msk.bf16.mxu1 %vm4778_vm11, %v4777_v12 }
 0x40a   : > { %4467 = vmatmul.mubr.msk.bf16.vlgmr.msra.gmra.mrb[64].mxu0 %vm1826_vm13, %v2118_v36  ;;  %4518 = vmatprep.subr.bf16.mxu1 %v4777_v12 }
 0x40b   : > { %4477 = vmatpush3.bf16.msra.mxu0 %v4726_v35  ;;  %4478 = vmatprep.mubr.msk.bf16.mxu0 %vm4778_vm11, %v4777_v12 }
 0x40c   : > { %4488 = vmatprep.subr.bf16.mxu0 %v4777_v12 }
 0x410   : > { %4509 = vmatmul.mubr.msk.bf16.vlgmr.msra.gmra.mrb[80].mxu1 %vm1826_vm13, %v5153_v23 }
 0x411   : > { %4519 = vmatpush3.bf16.msra.mxu1 %v4731_v37  ;;  %4520 = vmatprep.mubr.msk.bf16.mxu1 %vm4778_vm11, %v4777_v12 }
 0x412   : > { %4479 = vmatmul.mubr.msk.bf16.vlgmr.msra.gmra.mrb[68].mxu0 %vm1826_vm13, %v2226_v39  ;;  %4530 = vmatprep.subr.bf16.mxu1 %v4777_v12 }
 0x413   : > { %4489 = vmatpush3.bf16.msra.mxu0 %v4728_v38  ;;  %4490 = vmatprep.mubr.msk.bf16.mxu0 %vm4778_vm11, %v4777_v12 }
 0x414   : > { %4500 = vmatprep.subr.bf16.mxu0 %v4777_v12 }
 0x418   : > { %4521 = vmatmul.mubr.msk.bf16.vlgmr.msra.gmra.mrb[84].mxu1 %vm1826_vm13, %v1954_v34 }
 0x419   : > { %4531 = vmatpush3.bf16.msra.mxu1 %v4733_v40  ;;  %4532 = vmatprep.mubr.msk.bf16.mxu1 %vm4778_vm11, %v4777_v12 }
 0x41a   : > { %4491 = vmatmul.mubr.msk.bf16.vlgmr.msra.gmra.mrb[72].mxu0 %vm1826_vm13, %v2334_v42  ;;  %4542 = vmatprep.subr.bf16.mxu1 %v4777_v12 }
 0x41b   : > { %4501 = vmatpush3.bf16.msra.mxu0 %v4730_v41  ;;  %4502 = vmatprep.mubr.msk.bf16.mxu0 %vm4778_vm11, %v4777_v12 }
 0x41c   : > { %4512 = vmatprep.subr.bf16.mxu0 %v4777_v12 }
 0x420   : > { %4533 = vmatmul.mubr.msk.bf16.vlgmr.msra.gmra.mrb[88].mxu1 %vm1826_vm13, %v1955_v32 }
 0x421   : > { %4544 = vmatprep.mubr.msk.bf16.mxu1 %vm4778_vm11, %v4777_v12 }
 0x422   : > { %4503 = vmatmul.mubr.msk.bf16.vlgmr.msra.gmra.mrb[76].mxu0 %vm1826_vm13, %v2442_v44 }
 0x423   : > { %4513 = vmatpush3.bf16.msra.mxu0 %v4732_v43  ;;  %4514 = vmatprep.mubr.msk.bf16.mxu0 %vm4778_vm11, %v4777_v12 }
 0x424   : > { %4524 = vmatprep.subr.bf16.mxu0 %v4777_v12 }
 0x42a   : > { %4515 = vmatmul.mubr.msk.bf16.vlgmr.msra.gmra.mrb[80].mxu0 %vm1826_vm13, %v2550_v46 }
 0x42b   : > { %4525 = vmatpush3.bf16.msra.mxu0 %v4734_v45  ;;  %4526 = vmatprep.mubr.msk.bf16.mxu0 %vm4778_vm11, %v4777_v12 }
 0x42c   : > { %4536 = vmatprep.subr.bf16.mxu0 %v4777_v12 }
 0x432   : > { %4527 = vmatmul.mubr.msk.bf16.vlgmr.msra.gmra.mrb[84].mxu0 %vm1826_vm13, %v2658_v48 }
 0x433   : > { %4537 = vmatpush3.bf16.msra.mxu0 %v4735_v47  ;;  %4538 = vmatprep.mubr.msk.bf16.mxu0 %vm4778_vm11, %v4777_v12 }
 0x434   : > { %4572 = vmatprep.subr.bf16.mxu0 %v4777_v12 }
 0x43a   : > { %4539 = vmatmul.mubr.msk.bf16.vlgmr.msra.gmra.mrb[88].mxu0 %vm1826_vm13, %v2766_v49 }
 0x43b   : > { %4576 = vmatprep.mubr.msk.bf16.mxu0 %vm4778_vm11, %v4777_v12 }
 0x4c5   : > { %v2006_v50 = vpop.f32.mrb[52].mxu0 }
 0x4c6   : > { %v4450_v51 = vpop.f32.mrb[53].mxu0 }
 0x4c7   : > { %v2009_v52 = vpop.f32.mrb[54].mxu0 }
 0x4c8   : > { %v4451_v53 = vpop.f32.mrb[55].mxu0 }
 0x4cb   : > { %v2215_v54 = vpop.f32.mrb[68].mxu1 }
 0x4cc   : > { %v4474_v55 = vpop.f32.mrb[69].mxu1 }
 0x4cd   : > { %v2055_v56 = vpop.f32.mrb[56].mxu0  ;;  %v2218_v57 = vpop.f32.mrb[70].mxu1 }
 0x4ce   : > { %v2056_v58 = vadd.f32 %v2055_v56, %v2006_v50  ;;  %v4456_v59 = vpop.f32.mrb[57].mxu0  ;;  %v4475_v60 = vpop.f32.mrb[71].mxu1 }
 0x4cf   : > { %v2058_v61 = vpop.f32.mrb[58].mxu0 }
 0x4d0   : > { %v4457_v62 = vpop.f32.mrb[59].mxu0  ;;  %v4017_v61 = vld [vmem:[%s5452_s8] ss:$0 sm:$0xff] }
 0x4d3   : > { %v2323_v63 = vpop.f32.mrb[72].mxu1 }
 0x4d4   : > { %v4486_v0 = vpop.f32.mrb[73].mxu1 }
 0x4d5   : > { %v2107_v1 = vpop.f32.mrb[60].mxu0  ;;  %v2326_v2 = vpop.f32.mrb[74].mxu1 }
 0x4d6   : > { %v2113_v3 = vadd.f32 %v2107_v1, %v2056_v58  ;;  %v4462_v4 = vpop.f32.mrb[61].mxu0  ;;  %v4487_v5 = vpop.f32.mrb[75].mxu1 }
 0x4d7   : > { %v2110_v6 = vpop.f32.mrb[62].mxu0 }
 0x4d8   : > { %v4463_v7 = vpop.f32.mrb[63].mxu0 }
 0x4db   : > { %v2431_v8 = vpop.f32.mrb[76].mxu1 }
 0x4dc   : > { %v4498_v9 = vpop.f32.mrb[77].mxu1 }
 0x4dd   : > { %v2162_v10 = vpop.f32.mrb[64].mxu0  ;;  %v2434_v11 = vpop.f32.mrb[78].mxu1  ;;  %v4737_v9 = vld [vmem:[%s5453_s9 + $0x8] sm:$0xff]  }
 0x4de   : > { %v2168_v13 = vadd.f32 %v2162_v10, %v2113_v3  ;;  %v4468_v14 = vpop.f32.mrb[65].mxu0  ;;  %v4499_v15 = vpop.f32.mrb[79].mxu1  ;;  %v4738_v10 = vld [vmem:[%s5453_s9 + $0x10] sm:$0xff]   ;;  %v4739_v11 = vld [vmem:[%s5453_s9 + $0x18] sm:$0xff]  }
 0x4df   : > { %v2165_v16 = vpop.f32.mrb[66].mxu0  ;;  %v4741_v14 = vld [vmem:[%s5453_s9 + $0x28] sm:$0xff]   ;;  %v4742_v15 = vld [vmem:[%s5453_s9 + $0x30] ss:$0 sps:$4 sm:$0xff]  }
 0x4e0   : > { %v4469_v17 = vpop.f32.mrb[67].mxu0  ;;  %v2221_v18 = vadd.f32 %v2215_v54, %v2168_v13  ;;  %v4740_v13 = vld [vmem:[%s5453_s9 + $0x20] sm:$0xff]   ;;  %v4743_v16 = vld [vmem:[%s5454_s10 + $0x10] sm:$0xff]  }
 0x4e1   : > { %4573 = vmatpush3.bf16.msra.mxu0 %v4743_v16  ;;  %v4744_v17 = vld [vmem:[%s5454_s10 + $0x18] sm:$0xff]   ;;  %v4765_v16 = vld [vmem:[%s5454_s10 + $0xa8] sm:$0xff]  }
 0x4e2   : > { %4574 = vmatprep.subr.bf16.mxu0 %v4777_v12 }
 0x4e3   : > { %v2539_v19 = vpop.f32.mrb[80].mxu1 }
 0x4e4   : > { %v4510_v20 = vpop.f32.mrb[81].mxu1 }
 0x4e5   : > { %v2270_v21 = vpop.f32.mrb[68].mxu0  ;;  %v2542_v22 = vpop.f32.mrb[82].mxu1  ;;  %4575 = vmatpush3.bf16.msra.mxu0 %v4744_v17  ;;  %v4767_v17 = vld [vmem:[%s5454_s10 + $0xc0] sm:$0xff]  }
 0x4e6   : > { %v2276_v23 = vadd.f32 %v2270_v21, %v2221_v18  ;;  %v4480_v24 = vpop.f32.mrb[69].mxu0  ;;  %v4511_v25 = vpop.f32.mrb[83].mxu1  ;;  %4580 = vmatprep.subr.bf16.mxu0 %v4777_v12  ;;  %v4746_v18 = vld [vmem:[%s5454_s10 + $0x70] sm:$0xff]  }
 0x4e7   : > { %v2273_v26 = vpop.f32.mrb[70].mxu0  ;;  %v4745_v25 = vld [vmem:[%s5454_s10] sm:$0xff]  }
 0x4e8   : > { %v4481_v27 = vpop.f32.mrb[71].mxu0  ;;  %v2329_v28 = vadd.f32 %v2323_v63, %v2276_v23 }
 0x4e9   : > { %v4747_v27 = vld [vmem:[%s5454_s10 + $0x8] sm:$0xff]  }
 0x4eb   : > { %v2647_v29 = vpop.f32.mrb[84].mxu1 }
 0x4ec   : > { %v4522_v30 = vpop.f32.mrb[85].mxu1 }
 0x4ed   : > { %v2378_v31 = vpop.f32.mrb[72].mxu0  ;;  %v2650_v32 = vpop.f32.mrb[86].mxu1 }
 0x4ee   : > { %v2384_v33 = vadd.f32 %v2378_v31, %v2329_v28  ;;  %v4492_v34 = vpop.f32.mrb[73].mxu0  ;;  %v4523_v35 = vpop.f32.mrb[87].mxu1 }
 0x4ef   : > { %v2381_v36 = vpop.f32.mrb[74].mxu0  ;;  %v4749_v34 = vld [vmem:[%s5454_s10 + $0x28] sm:$0xff]  }
 0x4f0   : > { %v4493_v37 = vpop.f32.mrb[75].mxu0  ;;  %v2437_v38 = vadd.f32 %v2431_v8, %v2384_v33  ;;  %v4736_v8 = vld [vmem:[%s5453_s9] sm:$0xff]  }
 0x4f1   : > { %v4748_v33 = vld [vmem:[%s5454_s10 + $0x20] sm:$0xff]  }
 0x4f3   : > { %v2755_v39 = vpop.f32.mrb[88].mxu1 }
 0x4f4   : > { %v4534_v40 = vpop.f32.mrb[89].mxu1 }
 0x4f5   : > { %v2486_v41 = vpop.f32.mrb[76].mxu0  ;;  %v2758_v42 = vpop.f32.mrb[90].mxu1  ;;  %v4750_v40 = vld [vmem:[%s5454_s10 + $0x30] sm:$0xff]  }
 0x4f6   : > { %v2492_v43 = vadd.f32 %v2486_v41, %v2437_v38  ;;  %v4504_v44 = vpop.f32.mrb[77].mxu0  ;;  %v4535_v45 = vpop.f32.mrb[91].mxu1  ;;  %v4751_v41 = vld [vmem:[%s5454_s10 + $0x38] sm:$0xff]  }
 0x4f7   : > { %v2489_v46 = vpop.f32.mrb[78].mxu0 }
 0x4f8   : > { %v4505_v47 = vpop.f32.mrb[79].mxu0  ;;  %v2545_v48 = vadd.f32 %v2539_v19, %v2492_v43  ;;  %v4754_v19 = vld [vmem:[%s5454_s10 + $0x78] sm:$0xff]  }
 0x4f9   : > { %v4752_v47 = vld [vmem:[%s5454_s10 + $0x40] sm:$0xff]  }
 0x4fd   : > { %v2594_v49 = vpop.f32.mrb[80].mxu0 }
 0x4fe   : > { %v2600_v50 = vadd.f32 %v2594_v49, %v2545_v48  ;;  %v4516_v51 = vpop.f32.mrb[81].mxu0 }
 0x4ff   : > { %v2597_v52 = vpop.f32.mrb[82].mxu0  ;;  %v4753_v51 = vld [vmem:[%s5454_s10 + $0x48] sm:$0xff]  }
 0x500   : > { %v4517_v53 = vpop.f32.mrb[83].mxu0  ;;  %v2653_v54 = vadd.f32 %v2647_v29, %v2600_v50  ;;  %v4760_v50 = vld [vmem:[%s5454_s10 + $0x90] sm:$0xff]  }
 0x505   : > { %v2702_v55 = vpop.f32.mrb[84].mxu0 }
 0x506   : > { %v2708_v56 = vadd.f32 %v2702_v55, %v2653_v54  ;;  %v4528_v57 = vpop.f32.mrb[85].mxu0  ;;  %v4762_v54 = vld [vmem:[%s5454_s10 + $0x98] sm:$0xff]  }
 0x507   : > { %v2705_v58 = vpop.f32.mrb[86].mxu0 }
 0x508   : > { %v4529_v59 = vpop.f32.mrb[87].mxu0  ;;  %v2761_v60 = vadd.f32 %v2755_v39, %v2708_v56  ;;  %v4755_v58 = vld [vmem:[%s5454_s10 + $0x50] sm:$0xff]  }
 0x50d   : > { %v2810_v62 = vpop.f32.mrb[88].mxu0 }
 0x50e   : > { %v2816_v63 = vadd.f32 %v2810_v62, %v2761_v60  ;;  %v4540_v0 = vpop.f32.mrb[89].mxu0  ;;  %v4764_v60 = vld [vmem:[%s5454_s10 + $0xb0] sm:$0xff]  }
 0x50f   : > { %v2813_v1 = vpop.f32.mrb[90].mxu0 }
 0x510   : > { %v2823_v2 = vadd.f32 %v4017_v61, %v2816_v63  ;;  %v4541_v3 = vpop.f32.mrb[91].mxu0  ;;  %v4756_v61 = vld [vmem:[%s5454_s10 + $0x58] sm:$0xff]  }
 0x511   : > { %v4766_v1 = vld [vmem:[%s5454_s10 + $0xb8] sm:$0xff]  }
 0x512   : > { %vm2824_vm0 = vcmp.ge.f32.partialorder %v2823_v2, 0.0  ;;  %v2825_v4 = vmul.f32 0.01, %v2823_v2 }
 0x514   : > { %v2826_v5 = vsel %vm2824_vm0, %v2823_v2, %v2825_v4  ;;  %v4757_v4 = vld [vmem:[%s5454_s10 + $0x60] sm:$0xff]  }
 0x515   : > { %v2827_v6 = vpack.c.bf16 %v2826_v5, %v2826_v5 }
 0x517   : > { %v2897_v7 = vsel %vm948_vm2, %v2827_v6, 0 }
 0x518   : > { %4543 = vmatpush3.bf16.msra.mxu1 %v2897_v7  ;;  %v4758_v7 = vld [vmem:[%s5454_s10 + $0x68] sm:$0xff]  }
 0x519   : > { %4628 = vmatprep.subr.bf16.mxu1 %v4777_v12 }
 0x51b   : > { %4545 = vmatmul.mubr.msk.bf16.vlgmr.msra.gmra.mrb[92].mxu1 %vm944_vm12, %v4736_v8 }
 0x51c   : > { %4548 = vmatprep.mubr.msk.bf16.mxu1 %vm4778_vm11, %v4777_v12  ;;  %4629 = vmatpush3.bf16.msra.mxu1 %v4746_v18  ;;  %v4768_v18 = vld [vmem:[%s5454_s10 + $0xc8] sm:$0xff]  }
 0x51d   : > { %4630 = vmatprep.subr.bf16.mxu1 %v4777_v12 }
 0x520   : > { %4631 = vmatpush3.bf16.msra.mxu1 %v4754_v19 }
 0x521   : > { %4644 = vmatprep.subr.bf16.mxu1 %v4777_v12 }
 0x523   : > { %4549 = vmatmul.mubr.msk.bf16.gmra.mrb[96].mxu1 %vm944_vm12, %v4737_v9 }
 0x524   : > { %4552 = vmatprep.mubr.msk.bf16.mxu1 %vm4778_vm11, %v4777_v12 }
 0x52b   : > { %4553 = vmatmul.mubr.msk.bf16.gmra.mrb[100].mxu1 %vm944_vm12, %v4738_v10 }
 0x52c   : > { %4556 = vmatprep.mubr.msk.bf16.mxu1 %vm4778_vm11, %v4777_v12 }
 0x533   : > { %4557 = vmatmul.mubr.msk.bf16.gmra.mrb[104].mxu1 %vm944_vm12, %v4739_v11 }
 0x534   : > { %4560 = vmatprep.mubr.msk.bf16.mxu1 %vm4778_vm11, %v4777_v12 }
 0x53b   : > { %4561 = vmatmul.mubr.msk.bf16.gmra.mrb[108].mxu1 %vm944_vm12, %v4740_v13  ;;  %v4759_v13 = vld [vmem:[%s5454_s10 + $0x80] sm:$0xff]  }
 0x53c   : > { %4564 = vmatprep.mubr.msk.bf16.mxu1 %vm4778_vm11, %v4777_v12 }
 0x543   : > { %4565 = vmatmul.mubr.msk.bf16.gmra.mrb[112].mxu1 %vm944_vm12, %v4741_v14  ;;  %v4761_v14 = vld [vmem:[%s5454_s10 + $0x88] sm:$0xff]  }
 0x544   : > { %4568 = vmatprep.mubr.msk.bf16.mxu1 %vm4778_vm11, %v4777_v12 }
 0x54b   : > { %4569 = vmatmul.mubr.msk.bf16.gmra.mrb[116].mxu1 %vm944_vm12, %v4742_v15  ;;  %v4763_v15 = vld [vmem:[%s5454_s10 + $0xa0] sm:$0xff]  }
 0x54c   : > { %4632 = vmatprep.mubr.msk.bf16.mxu1 %vm4778_vm11, %v4777_v12 }
 0x5ee   : > { %v2933_v20 = vpop.f32.mrb[92].mxu1 }
 0x5ef   : > { %v4546_v21 = vpop.f32.mrb[93].mxu1 }
 0x5f0   : > { %v2936_v22 = vpop.f32.mrb[94].mxu1 }
 0x5f1   : > { %v2987_v23 = vpack.c.bf16 %v2936_v22, %v2933_v20  ;;  %v4547_v24 = vpop.f32.mrb[95].mxu1 }
 0x5f3   : > { %v3004_v26 = vrot.slane %v2987_v23, 4 }
 0x5f5   : > { %4577 = vmatmul.mubr.msk.bf16.vlgmr.msra.gmra.mrb[92].mxu0 %vm3017_vm1, %v3004_v26 }
 0x5f6   : > { %4581 = vmatpush3.bf16.msra.mxu0 %v4745_v25  ;;  %4584 = vmatprep.mubr.msk.bf16.mxu0 %vm4778_vm11, %v4777_v12  ;;  %v2941_v28 = vpop.f32.mrb[96].mxu1 }
 0x5f7   : > { %4582 = vmatprep.subr.bf16.mxu0 %v4777_v12  ;;  %v4550_v29 = vpop.f32.mrb[97].mxu1 }
 0x5f8   : > { %v2944_v30 = vpop.f32.mrb[98].mxu1 }
 0x5f9   : > { %v2988_v31 = vpack.c.bf16 %v2944_v30, %v2941_v28  ;;  %v4551_v32 = vpop.f32.mrb[99].mxu1 }
 0x5fa   : > { %4583 = vmatpush3.bf16.msra.mxu0 %v4747_v27 }
 0x5fb   : > { %4588 = vmatprep.subr.bf16.mxu0 %v4777_v12  ;;  %v3183_v48 = vrot.slane %v2988_v31, 4 }
 0x5fd   : > { %4585 = vmatmul.mubr.msk.bf16.vlgmr.msra.gmra.mrb[96].mxu0 %vm3017_vm1, %v2987_v23 }
 0x5fe   : > { %4589 = vmatpush3.bf16.msra.mxu0 %v4748_v33  ;;  %4592 = vmatprep.mubr.msk.bf16.mxu0 %vm4778_vm11, %v4777_v12  ;;  %v2949_v35 = vpop.f32.mrb[100].mxu1 }
 0x5ff   : > { %4590 = vmatprep.subr.bf16.mxu0 %v4777_v12  ;;  %v4554_v36 = vpop.f32.mrb[101].mxu1 }
 0x600   : > { %v2952_v37 = vpop.f32.mrb[102].mxu1 }
 0x601   : > { %v5326_v38 = vpack.c.bf16 %v2952_v37, %v2949_v35  ;;  %v4555_v39 = vpop.f32.mrb[103].mxu1 }
 0x602   : > { %4591 = vmatpush3.bf16.msra.mxu0 %v4749_v34 }
 0x603   : > { %4596 = vmatprep.subr.bf16.mxu0 %v4777_v12  ;;  %v3307_v5 = vrot.slane %v5326_v38, 4 }
 0x605   : > { %4593 = vmatmul.mubr.msk.bf16.vlgmr.msra.gmra.mrb[100].mxu0 %vm3017_vm1, %v2988_v31 }
 0x606   : > { %4597 = vmatpush3.bf16.msra.mxu0 %v4750_v40  ;;  %4600 = vmatprep.mubr.msk.bf16.mxu0 %vm4778_vm11, %v4777_v12  ;;  %v2957_v42 = vpop.f32.mrb[104].mxu1 }
 0x607   : > { %4598 = vmatprep.subr.bf16.mxu0 %v4777_v12  ;;  %v4558_v43 = vpop.f32.mrb[105].mxu1 }
 0x608   : > { %v2960_v44 = vpop.f32.mrb[106].mxu1 }
 0x609   : > { %v5339_v45 = vpack.c.bf16 %v2960_v44, %v2957_v42  ;;  %v4559_v46 = vpop.f32.mrb[107].mxu1 }
 0x60a   : > { %4599 = vmatpush3.bf16.msra.mxu0 %v4751_v41 }
 0x60b   : > { %4604 = vmatprep.subr.bf16.mxu0 %v4777_v12  ;;  %v3431_v49 = vrot.slane %v5339_v45, 4 }
 0x60d   : > { %4601 = vmatmul.mubr.msk.bf16.vlgmr.msra.gmra.mrb[104].mxu0 %vm3017_vm1, %v3183_v48  ;;  %4633 = vmatmul.mubr.msk.bf16.vlgmr.msra.gmra.mrb[120].mxu1 %vm3017_vm1, %v3431_v49 }
 0x60e   : > { %4605 = vmatpush3.bf16.msra.mxu0 %v4752_v47  ;;  %4608 = vmatprep.mubr.msk.bf16.mxu0 %vm4778_vm11, %v4777_v12  ;;  %v2965_v52 = vpop.f32.mrb[108].mxu1 }
 0x60f   : > { %4606 = vmatprep.subr.bf16.mxu0 %v4777_v12  ;;  %4645 = vmatpush3.bf16.msra.mxu1 %v4760_v50  ;;  %v4562_v53 = vpop.f32.mrb[109].mxu1 }
 0x610   : > { %v2968_v55 = vpop.f32.mrb[110].mxu1  ;;  %4646 = vmatprep.subr.bf16.mxu1 %v4777_v12  ;;  %4648 = vmatprep.mubr.msk.bf16.mxu1 %vm4778_vm11, %v4777_v12 }
 0x611   : > { %v2991_v56 = vpack.c.bf16 %v2968_v55, %v2965_v52  ;;  %v4563_v57 = vpop.f32.mrb[111].mxu1 }
 0x612   : > { %4607 = vmatpush3.bf16.msra.mxu0 %v4753_v51 }
 0x613   : > { %4612 = vmatprep.subr.bf16.mxu0 %v4777_v12  ;;  %v3555_v59 = vrot.slane %v2991_v56, 4  ;;  %4647 = vmatpush3.bf16.msra.mxu1 %v4762_v54 }
 0x614   : > { %4660 = vmatprep.subr.bf16.mxu1 %v4777_v12 }
 0x615   : > { %4609 = vmatmul.mubr.msk.bf16.vlgmr.msra.gmra.mrb[108].mxu0 %vm3017_vm1, %v5326_v38 }
 0x616   : > { %4613 = vmatpush3.bf16.msra.mxu0 %v4755_v58  ;;  %4616 = vmatprep.mubr.msk.bf16.mxu0 %vm4778_vm11, %v4777_v12  ;;  %v2973_v62 = vpop.f32.mrb[112].mxu1 }
 0x617   : > { %4614 = vmatprep.subr.bf16.mxu0 %v4777_v12  ;;  %4649 = vmatmul.mubr.msk.bf16.vlgmr.msra.gmra.mrb[124].mxu1 %vm3017_vm1, %v3555_v59  ;;  %v4566_v63 = vpop.f32.mrb[113].mxu1 }
 0x618   : > { %4661 = vmatpush3.bf16.msra.mxu1 %v4764_v60  ;;  %v2976_v0 = vpop.f32.mrb[114].mxu1  ;;  %4664 = vmatprep.mubr.msk.bf16.mxu1 %vm4778_vm11, %v4777_v12 }
 0x619   : > { %v2992_v2 = vpack.c.bf16 %v2976_v0, %v2973_v62  ;;  %4662 = vmatprep.subr.bf16.mxu1 %v4777_v12  ;;  %v4567_v3 = vpop.f32.mrb[115].mxu1 }
 0x61a   : > { %4615 = vmatpush3.bf16.msra.mxu0 %v4756_v61 }
 0x61b   : > { %4620 = vmatprep.subr.bf16.mxu0 %v4777_v12  ;;  %v3679_v6 = vrot.slane %v2992_v2, 4 }
 0x61c   : > { %4663 = vmatpush3.bf16.msra.mxu1 %v4766_v1 }
 0x61d   : > { %4617 = vmatmul.mubr.msk.bf16.vlgmr.msra.gmra.mrb[112].mxu0 %vm3017_vm1, %v3307_v5 }
 0x61e   : > { %4621 = vmatpush3.bf16.msra.mxu0 %v4757_v4  ;;  %4624 = vmatprep.mubr.msk.bf16.mxu0 %vm4778_vm11, %v4777_v12  ;;  %v2981_v8 = vpop.f32.mrb[116].mxu1 }
 0x61f   : > { %4622 = vmatprep.subr.bf16.mxu0 %v4777_v12  ;;  %4665 = vmatmul.mubr.msk.bf16.vlgmr.msra.gmra.mrb[128].mxu1 %vm3017_vm1, %v3679_v6  ;;  %v4570_v9 = vpop.f32.mrb[117].mxu1  ;;  %v2993_v19 = vpack.c.bf16 %v2981_v8, %v2981_v8 }
 0x620   : > { %v2984_v10 = vpop.f32.mrb[118].mxu1 }
 0x621   : > { %v4571_v11 = vpop.f32.mrb[119].mxu1 }
 0x622   : > { %4623 = vmatpush3.bf16.msra.mxu0 %v4758_v7 }
 0x623   : > { %4636 = vmatprep.subr.bf16.mxu0 %v4777_v12 }
 0x625   : > { %4625 = vmatmul.mubr.msk.bf16.vlgmr.msra.gmra.mrb[116].mxu0 %vm3017_vm1, %v5339_v45 }
 0x626   : > { %4637 = vmatpush3.bf16.msra.mxu0 %v4759_v13  ;;  %4640 = vmatprep.mubr.msk.bf16.mxu0 %vm4778_vm11, %v4777_v12 }
 0x627   : > { %4638 = vmatprep.subr.bf16.mxu0 %v4777_v12 }
 0x62a   : > { %4639 = vmatpush3.bf16.msra.mxu0 %v4761_v14 }
 0x62b   : > { %4652 = vmatprep.subr.bf16.mxu0 %v4777_v12 }
 0x62d   : > { %4641 = vmatmul.mubr.msk.bf16.vlgmr.msra.gmra.mrb[120].mxu0 %vm3017_vm1, %v2991_v56 }
 0x62e   : > { %4653 = vmatpush3.bf16.msra.mxu0 %v4763_v15  ;;  %4656 = vmatprep.mubr.msk.bf16.mxu0 %vm4778_vm11, %v4777_v12  ;;  %v2828_v15 = vld [vmem:[%s5455_s11] sm:$0xff] }
 0x62f   : > { %4654 = vmatprep.subr.bf16.mxu0 %v4777_v12 }
 0x632   : > { %4655 = vmatpush3.bf16.msra.mxu0 %v4765_v16 }
 0x633   : > { %4668 = vmatprep.subr.bf16.mxu0 %v4777_v12 }
 0x635   : > { %4657 = vmatmul.mubr.msk.bf16.vlgmr.msra.gmra.mrb[124].mxu0 %vm3017_vm1, %v2992_v2 }
 0x636   : > { %4669 = vmatpush3.bf16.msra.mxu0 %v4767_v17  ;;  %4672 = vmatprep.mubr.msk.bf16.mxu0 %vm4778_vm11, %v4777_v12 }
 0x637   : > { %4670 = vmatprep.subr.bf16.mxu0 %v4777_v12 }
 0x63a   : > { %4671 = vmatpush3.bf16.msra.mxu0 %v4768_v18 }
 0x63d   : > { %4673 = vmatmul.mubr.msk.bf16.vlgmr.msra.gmra.mrb[128].mxu0 %vm3017_vm1, %v2993_v19 }
 0x6c8   : > { %v3055_v20 = vpop.f32.mrb[92].mxu0 }
 0x6c9   : > { %v4578_v21 = vpop.f32.mrb[93].mxu0 }
 0x6ca   : > { %v3058_v22 = vpop.f32.mrb[94].mxu0 }
 0x6cb   : > { %v4579_v23 = vpop.f32.mrb[95].mxu0 }
 0x6d0   : > { %v3110_v24 = vpop.f32.mrb[96].mxu0 }
 0x6d1   : > { %v3111_v25 = vadd.f32 %v3110_v24, %v3055_v20  ;;  %v4586_v26 = vpop.f32.mrb[97].mxu0 }
 0x6d2   : > { %v3113_v27 = vpop.f32.mrb[98].mxu0 }
 0x6d3   : > { %v4587_v28 = vpop.f32.mrb[99].mxu0 }
 0x6d8   : > { %v3170_v29 = vpop.f32.mrb[100].mxu0 }
 0x6d9   : > { %v3176_v30 = vadd.f32 %v3170_v29, %v3111_v25  ;;  %v4594_v31 = vpop.f32.mrb[101].mxu0 }
 0x6da   : > { %v3173_v32 = vpop.f32.mrb[102].mxu0 }
 0x6db   : > { %v4595_v33 = vpop.f32.mrb[103].mxu0 }
 0x6e0   : > { %v3233_v34 = vpop.f32.mrb[104].mxu0  ;;  %v3481_v12 = vpop.f32.mrb[120].mxu1 }
 0x6e1   : > { %v3239_v35 = vadd.f32 %v3233_v34, %v3176_v30  ;;  %v4602_v36 = vpop.f32.mrb[105].mxu0  ;;  %v4634_v37 = vpop.f32.mrb[121].mxu1 }
 0x6e2   : > { %v3236_v38 = vpop.f32.mrb[106].mxu0  ;;  %v3484_v39 = vpop.f32.mrb[122].mxu1 }
 0x6e3   : > { %v4603_v40 = vpop.f32.mrb[107].mxu0  ;;  %v4635_v41 = vpop.f32.mrb[123].mxu1 }
 0x6e8   : > { %v3294_v42 = vpop.f32.mrb[108].mxu0 }
 0x6e9   : > { %v3300_v43 = vadd.f32 %v3294_v42, %v3239_v35  ;;  %v4610_v44 = vpop.f32.mrb[109].mxu0 }
 0x6ea   : > { %v3297_v45 = vpop.f32.mrb[110].mxu0  ;;  %v3605_v46 = vpop.f32.mrb[124].mxu1 }
 0x6eb   : > { %v4611_v47 = vpop.f32.mrb[111].mxu0  ;;  %v4650_v48 = vpop.f32.mrb[125].mxu1 }
 0x6ec   : > { %v3608_v49 = vpop.f32.mrb[126].mxu1 }
 0x6ed   : > { %v4651_v50 = vpop.f32.mrb[127].mxu1 }
 0x6f0   : > { %v3357_v51 = vpop.f32.mrb[112].mxu0 }
 0x6f1   : > { %v3363_v52 = vadd.f32 %v3357_v51, %v3300_v43  ;;  %v4618_v53 = vpop.f32.mrb[113].mxu0 }
 0x6f2   : > { %v3360_v54 = vpop.f32.mrb[114].mxu0  ;;  %v3729_v55 = vpop.f32.mrb[128].mxu1 }
 0x6f3   : > { %v4619_v56 = vpop.f32.mrb[115].mxu0  ;;  %v4666_v57 = vpop.f32.mrb[129].mxu1 }
 0x6f4   : > { %v3732_v58 = vpop.f32.mrb[130].mxu1 }
 0x6f5   : > { %v4667_v59 = vpop.f32.mrb[131].mxu1 }
 0x6f8   : > { %v3418_v60 = vpop.f32.mrb[116].mxu0 }
 0x6f9   : > { %v3424_v61 = vadd.f32 %v3418_v60, %v3363_v52  ;;  %v4626_v62 = vpop.f32.mrb[117].mxu0 }
 0x6fa   : > { %v3421_v63 = vpop.f32.mrb[118].mxu0 }
 0x6fb   : > { %v3487_v0 = vadd.f32 %v3481_v12, %v3424_v61  ;;  %v4627_v1 = vpop.f32.mrb[119].mxu0 }
 0x700   : > { %v3542_v2 = vpop.f32.mrb[120].mxu0 }
 0x701   : > { %v3548_v3 = vadd.f32 %v3542_v2, %v3487_v0  ;;  %v4642_v4 = vpop.f32.mrb[121].mxu0 }
 0x702   : > { %v3545_v5 = vpop.f32.mrb[122].mxu0 }
 0x703   : > { %v3611_v6 = vadd.f32 %v3605_v46, %v3548_v3  ;;  %v4643_v7 = vpop.f32.mrb[123].mxu0 }
 0x708   : > { %v3666_v8 = vpop.f32.mrb[124].mxu0 }
 0x709   : > { %v3672_v9 = vadd.f32 %v3666_v8, %v3611_v6  ;;  %v4658_v10 = vpop.f32.mrb[125].mxu0 }
 0x70a   : > { %v3669_v11 = vpop.f32.mrb[126].mxu0 }
 0x70b   : > { %v3735_v13 = vadd.f32 %v3729_v55, %v3672_v9  ;;  %v4659_v14 = vpop.f32.mrb[127].mxu0 }
 0x710   : > { %v3790_v16 = vpop.f32.mrb[128].mxu0 }
 0x711   : > { %v3796_v17 = vadd.f32 %v3790_v16, %v3735_v13  ;;  %v4674_v18 = vpop.f32.mrb[129].mxu0 }
 0x712   : > { %v3793_v19 = vpop.f32.mrb[130].mxu0 }
 0x713   : > { %v3797_v20 = vadd.f32 %v3796_v17, %v2828_v15  ;;  %v4675_v21 = vpop.f32.mrb[131].mxu0 }
 0x715   : > { %3798 = vst [vmem:[%s411_s18] sm:$0xff] %v3797_v20 }
 0x716 PF: > { %s22_s21 = sadd.s32 1, %s4775_s21  }
 0x717   : > { %p19_p4 = scmp.ge.s32.totalorder %s22_s21, 4  }
 0x719   :  { %21 = sbr.rel (!%p19_p4) target bundleno = 1 (0x1), region = 140 }

</bundles_post_ra>
